<compile_context>
chip_gen: v6e
topology: v6e:2x2x1
jax: 0.10.0
libtpu: 0.0.40
codegen_flags: <defaults>
</compile_context>

<pallas_src>
import functools

import jax
import jax.numpy as jnp
from jax import lax
from jax.experimental import pallas as pl
from jax.experimental.pallas import tpu as pltpu

_BF16 = jnp.bfloat16
_F32 = jnp.float32


def _mm(a, b):        # a @ b          (bf16 in, f32 accumulate)
    return lax.dot_general(a.astype(_BF16), b.astype(_BF16),
                           (((1,), (0,)), ((), ())),
                           preferred_element_type=_F32)


def _mm_nt(a, b):     # a @ b.T
    return lax.dot_general(a.astype(_BF16), b.astype(_BF16),
                           (((1,), (1,)), ((), ())),
                           preferred_element_type=_F32)


def _mm_tn(a, b):     # a.T @ b
    return lax.dot_general(a.astype(_BF16), b.astype(_BF16),
                           (((0,), (0,)), ((), ())),
                           preferred_element_type=_F32)


def hamburger_kernel(x_ref, w_in_ref, b_in_ref, w_out_ref, b_out_ref,
                     bases_ref, o_ref, *, steps, bb, n_pad, n_valid):
    """One batch-block (bb elements) per grid step, fully fused per element.

    x_ref     : (bb, C, Npad)  input in natural layout (zero padded along N)
    w_in_ref  : (C, C)         ham_in 1x1 conv weight
    b_in_ref  : (C, 1)         ham_in bias
    w_out_ref : (C, C)         ham_out 1x1 conv weight
    b_out_ref : (C, 1)         ham_out bias
    bases_ref : (bb, R, C)     NMF bases, pre-transposed to (R, D)
    o_ref     : (bb, C, Npad)  output
    """
    eps = 1e-6
    r = bases_ref.shape[1]

    w_in = w_in_ref[...]
    b_in = b_in_ref[...]
    w_out = w_out_ref[...]
    b_out = b_out_ref[...]

    # Validity mask for zero-padded spatial columns: padded columns must carry
    # zero coefficients so they never pollute the coef^T@coef Gram matrix.
    if n_valid < n_pad:
        col = lax.broadcasted_iota(jnp.int32, (r, n_pad), 1)
        valid = col < n_valid                                     # (R, Npad)
    else:
        valid = None

    # Per-batch-element chains are independent -> the unrolled region lets the
    # scheduler interleave the tiny (R=16) MXU ops across chains when bb >= 2.
    for i in range(bb):
        # ham_in: (C,C)@(C,Npad) lane-dense matmul + bias + ReLU.  x is NOT
        # kept live; it is re-read from the resident block for the residual.
        z_i = jnp.maximum(_mm(w_in, x_ref[i]) + b_in, 0.0).astype(_BF16)

        basesT = bases_ref[i]                                     # (R, C) f32

        # softmax(inv_t * z^T @ bases, dim=-1) with inv_t == 1, held in the
        # transposed (R, Npad) layout (softmax over the R axis).
        s_raw = _mm(basesT, z_i)                                  # (R, Npad)
        m = jnp.max(s_raw, axis=0, keepdims=True)
        e = jnp.exp(s_raw - m)
        coefT = e / jnp.sum(e, axis=0, keepdims=True)
        if valid is not None:
            coefT = jnp.where(valid, coefT, 0.0)

        # local_step: multiplicative NMF updates (transposed layout).
        # s_raw is reused as the iteration-0 numerator (bases unchanged).
        num_c = s_raw
        for t in range(steps):
            if t > 0:
                num_c = _mm(basesT, z_i)                          # (R, Npad)
            gram_b = _mm_nt(basesT, basesT)                       # (R, R)
            den_c = _mm(gram_b, coefT)                            # (R, Npad)
            coefT = coefT * num_c / (den_c + eps)

            num_b = _mm_nt(coefT, z_i)                            # (R, C)
            gram_c = _mm_nt(coefT, coefT)                         # (R, R)
            den_b = _mm(gram_c, basesT)                           # (R, C)
            basesT = basesT * num_b / (den_b + eps)

        # compute_coef: one extra coefficient update, then re-mask padding.
        num_c = _mm(basesT, z_i)
        gram_b = _mm_nt(basesT, basesT)
        den_c = _mm(gram_b, coefT)
        coefT = coefT * num_c / (den_c + eps)
        if valid is not None:
            coefT = jnp.where(valid, coefT, 0.0)

        # reconstruction: bases @ coef^T == basesT^T @ coefT -> (C, Npad)
        y_i = _mm_tn(basesT, coefT)

        # ham_out + bias, residual (x re-read from VMEM), ReLU.
        out = _mm(w_out, y_i) + b_out
        o_ref[i] = jnp.maximum(x_ref[i] + out, 0.0)


def _pick_block_and_vmem(B, C, R, n_pad, batch_block):
    """Pick batch_block (bb) and a VMEM request from a per-chip budget."""
    try:
        kind = jax.devices()[0].device_kind.lower()
    except Exception:  # pragma: no cover - defensive
        kind = ""
    if "v7" in kind:
        cap = 48 << 20          # 64 MiB physical per TC -> leave headroom
    elif "v5" in kind or "v6" in kind:
        cap = 96 << 20          # 128 MiB physical; defaults are 16/32 MiB
    else:
        cap = 48 << 20          # conservative default

    plane_f32 = C * n_pad * 4

    def step_bytes(bb):
        # 2x double-buffered input + 2x double-buffered output + bases (x2)
        # + weights (x2) + ~4 live f32 (C, Npad) intermediates per chain.
        return (4 * bb * plane_f32 + 2 * bb * R * C * 4
                + 4 * (C * C + C) * 4 + 4 * bb * plane_f32)

    if batch_block is None:
        bb = 1
        # Two independent NMF chains per step helps hide MXU drain latency on
        # v5e/v6e, but never collapse the grid below 2 steps (dual-TC on v7x).
        if B >= 4 and B % 2 == 0 and step_bytes(2) <= cap:
            bb = 2
    else:
        bb = batch_block
    assert B % bb == 0, "batch_block must divide B"

    vmem_limit = int(min(cap, max(2 * step_bytes(bb), 32 << 20)))
    return bb, vmem_limit


def hamburger_forward(x, w_in, b_in, w_out, b_out, bases, *, steps,
                      batch_block=None):
    """x: (B, C, H, W) float32.  bases: (B, C, R), L2-normalized along C."""
    B, C, H, W = x.shape
    N = H * W
    R = bases.shape[-1]
    n_pad = ((N + 127) // 128) * 128              # lane-dense stores

    # Natural layout: (B, C, N) is just a reshape (no HBM transpose pass).
    # Only pad the spatial axis when N is not already a lane multiple.
    x_bcn = x.reshape(B, C, N)
    if n_pad != N:
        x_bcn = jnp.pad(x_bcn, ((0, 0), (0, 0), (0, n_pad - N)))

    basesT = jnp.transpose(bases, (0, 2, 1))      # (B, R, C), tiny tensor

    bb, vmem_limit = _pick_block_and_vmem(B, C, R, n_pad, batch_block)

    kernel = functools.partial(hamburger_kernel, steps=steps, bb=bb,
                               n_pad=n_pad, n_valid=N)

    out_bcn = pl.pallas_call(
        kernel,
        out_shape=jax.ShapeDtypeStruct((B, C, n_pad), jnp.float32),
        grid_spec=pltpu.PrefetchScalarGridSpec(
            num_scalar_prefetch=0,
            grid=(B // bb,),
            in_specs=[
                pl.BlockSpec((bb, C, n_pad), lambda g: (g, 0, 0)),  # x block
                pl.BlockSpec((C, C), lambda g: (0, 0)),             # w_in
                pl.BlockSpec((C, 1), lambda g: (0, 0)),             # b_in
                pl.BlockSpec((C, C), lambda g: (0, 0)),             # w_out
                pl.BlockSpec((C, 1), lambda g: (0, 0)),             # b_out
                pl.BlockSpec((bb, R, C), lambda g: (g, 0, 0)),      # bases^T
            ],
            out_specs=pl.BlockSpec((bb, C, n_pad), lambda g: (g, 0, 0)),
        ),
        compiler_params=pltpu.CompilerParams(
            dimension_semantics=("parallel",),
            vmem_limit_bytes=vmem_limit),
    )(x_bcn, w_in, b_in, w_out, b_out, basesT)

    out = out_bcn[:, :, :N] if n_pad != N else out_bcn
    return out.reshape(B, C, H, W)


if __name__ == "__main__":
    # Small shapes consistent with the module: ham_channels=C, MD_S=1, MD_R=R.
    B, C, H, W, R = 2, 64, 8, 8, 16
    # A freshly constructed nn.Module is in training mode -> TRAIN_STEPS = 6.
    STEPS = 6

    key = jax.random.PRNGKey(0)
    k_x, k_wi, k_bi, k_wo, k_bo, k_bs = jax.random.split(key, 6)

    x = jax.random.uniform(k_x, (B, C, H, W), jnp.float32)

    # nn.Conv2d(C, C, 1) weights: (C_out, C_in, 1, 1) stored as (C, C); bias (C,1).
    fan = 1.0 / jnp.sqrt(jnp.float32(C))
    w_in = jax.random.uniform(k_wi, (C, C), jnp.float32, -fan, fan)
    b_in = jax.random.uniform(k_bi, (C, 1), jnp.float32, -fan, fan)
    w_out = jax.random.uniform(k_wo, (C, C), jnp.float32, -fan, fan)
    b_out = jax.random.uniform(k_bo, (C, 1), jnp.float32, -fan, fan)

    # NMF2D._build_bases: uniform (B*S, D, R) then F.normalize(dim=1) (L2 over D).
    bases = jax.random.uniform(k_bs, (B, C, R), jnp.float32)
    bases = bases / jnp.linalg.norm(bases, axis=1, keepdims=True)

    out = hamburger_forward(x, w_in, b_in, w_out, b_out, bases, steps=STEPS)
    jax.block_until_ready(out)
    assert out.shape == (B, C, H, W) and out.dtype == jnp.float32
    assert bool(jnp.all(jnp.isfinite(out)))
    print("KERNEL_OK")
</pallas_src>

<mosaic_0001>
module attributes {stable_mosaic.version = 11 : i64} {
  func.func @hamburger_kernel(%arg0: i32, %arg1: memref<1x64x128xf32, #tpu.memory_space<vmem>>, %arg2: memref<64x64xf32, #tpu.memory_space<vmem>>, %arg3: memref<64x1xf32, #tpu.memory_space<vmem>>, %arg4: memref<64x64xf32, #tpu.memory_space<vmem>>, %arg5: memref<64x1xf32, #tpu.memory_space<vmem>>, %arg6: memref<1x16x64xf32, #tpu.memory_space<vmem>>, %arg7: memref<1x64x128xf32, #tpu.memory_space<vmem>>) attributes {dimension_semantics = [#tpu.dimension_semantics<parallel>], iteration_bounds = array<i64: 2>, scalar_prefetch = 0 : i64, scratch_operands = 0 : i64, tpu.core_type = #tpu.core_type<tc>, window_params = [{transform_indices = @transform_0, window_bounds = array<i64: 1, 64, 128>}, {pipeline_mode = #tpu.pipeline_mode<synchronous>, transform_indices = @transform_1, window_bounds = array<i64: 64, 64>}, {pipeline_mode = #tpu.pipeline_mode<synchronous>, transform_indices = @transform_2, window_bounds = array<i64: 64, 1>}, {pipeline_mode = #tpu.pipeline_mode<synchronous>, transform_indices = @transform_3, window_bounds = array<i64: 64, 64>}, {pipeline_mode = #tpu.pipeline_mode<synchronous>, transform_indices = @transform_4, window_bounds = array<i64: 64, 1>}, {transform_indices = @transform_5, window_bounds = array<i64: 1, 16, 64>}, {transform_indices = @transform_6, window_bounds = array<i64: 1, 64, 128>}]} {
    %c0 = arith.constant 0 : index
    %c0_0 = arith.constant 0 : index
    %0 = vector.load %arg2[%c0, %c0_0] : memref<64x64xf32, #tpu.memory_space<vmem>>, vector<64x64xf32>
    %c0_1 = arith.constant 0 : index
    %c0_2 = arith.constant 0 : index
    %1 = vector.load %arg3[%c0_1, %c0_2] : memref<64x1xf32, #tpu.memory_space<vmem>>, vector<64x1xf32>
    %c0_3 = arith.constant 0 : index
    %c0_4 = arith.constant 0 : index
    %2 = vector.load %arg4[%c0_3, %c0_4] : memref<64x64xf32, #tpu.memory_space<vmem>>, vector<64x64xf32>
    %c0_5 = arith.constant 0 : index
    %c0_6 = arith.constant 0 : index
    %3 = vector.load %arg5[%c0_5, %c0_6] : memref<64x1xf32, #tpu.memory_space<vmem>>, vector<64x1xf32>
    %4 = tpu.iota {dimensions = array<i32: 1>} : vector<16x128xi32>
    %c64_i32 = arith.constant 64 : i32
    %5 = vector.broadcast %c64_i32 : i32 to vector<16x128xi32>
    %6 = arith.cmpi slt, %4, %5 : vector<16x128xi32>
    %c0_7 = arith.constant 0 : index
    %c0_8 = arith.constant 0 : index
    %c0_9 = arith.constant 0 : index
    %7 = vector.load %arg1[%c0_7, %c0_8, %c0_9] : memref<1x64x128xf32, #tpu.memory_space<vmem>>, vector<1x64x128xf32>
    %8 = vector.shape_cast %7 : vector<1x64x128xf32> to vector<64x128xf32>
    %9 = arith.truncf %0 : vector<64x64xf32> to vector<64x64xbf16>
    %10 = arith.truncf %8 : vector<64x128xf32> to vector<64x128xbf16>
    %cst = arith.constant dense<0.000000e+00> : vector<64x128xf32>
    %11 = tpu.matmul %9, %10, %cst {dimension_numbers = #tpu.dot_dimension_numbers<[1], [0], [0], [1], [0, 0, 1, 1], [], []>} : vector<64x64xbf16>, vector<64x128xbf16>, vector<64x128xf32> -> vector<64x128xf32>
    %12 = vector.broadcast %1 : vector<64x1xf32> to vector<64x128xf32>
    %13 = arith.addf %11, %12 : vector<64x128xf32>
    %cst_10 = arith.constant 0.000000e+00 : f32
    %14 = vector.broadcast %cst_10 : f32 to vector<64x128xf32>
    %15 = arith.maximumf %13, %14 : vector<64x128xf32>
    %16 = arith.truncf %15 : vector<64x128xf32> to vector<64x128xbf16>
    %c0_11 = arith.constant 0 : index
    %c0_12 = arith.constant 0 : index
    %c0_13 = arith.constant 0 : index
    %17 = vector.load %arg6[%c0_11, %c0_12, %c0_13] : memref<1x16x64xf32, #tpu.memory_space<vmem>>, vector<1x16x64xf32>
    %18 = vector.shape_cast %17 : vector<1x16x64xf32> to vector<16x64xf32>
    %19 = arith.truncf %18 : vector<16x64xf32> to vector<16x64xbf16>
    %cst_14 = arith.constant dense<0.000000e+00> : vector<16x128xf32>
    %20 = tpu.matmul %19, %16, %cst_14 {dimension_numbers = #tpu.dot_dimension_numbers<[1], [0], [0], [1], [0, 0, 1, 1], [], []>} : vector<16x64xbf16>, vector<64x128xbf16>, vector<16x128xf32> -> vector<16x128xf32>
    %cst_15 = arith.constant dense<0xFF800000> : vector<128xf32>
    %21 = vector.multi_reduction <maximumf>, %20, %cst_15 [0] : vector<16x128xf32> to vector<128xf32>
    %22 = vector.shape_cast %21 : vector<128xf32> to vector<1x128xf32>
    %23 = vector.broadcast %22 : vector<1x128xf32> to vector<16x128xf32>
    %24 = arith.subf %20, %23 : vector<16x128xf32>
    %25 = math.exp %24 : vector<16x128xf32>
    %cst_16 = arith.constant dense<0.000000e+00> : vector<128xf32>
    %26 = vector.multi_reduction <add>, %25, %cst_16 [0] : vector<16x128xf32> to vector<128xf32>
    %27 = vector.shape_cast %26 : vector<128xf32> to vector<1x128xf32>
    %28 = vector.broadcast %27 : vector<1x128xf32> to vector<16x128xf32>
    %29 = arith.divf %25, %28 : vector<16x128xf32>
    %cst_17 = arith.constant 0.000000e+00 : f32
    %30 = vector.broadcast %cst_17 : f32 to vector<16x128xf32>
    %31 = arith.select %6, %29, %30 : vector<16x128xi1>, vector<16x128xf32>
    %32 = arith.truncf %18 : vector<16x64xf32> to vector<16x64xbf16>
    %33 = arith.truncf %18 : vector<16x64xf32> to vector<16x64xbf16>
    %cst_18 = arith.constant dense<0.000000e+00> : vector<16x16xf32>
    %34 = tpu.matmul %32, %33, %cst_18 {dimension_numbers = #tpu.dot_dimension_numbers<[1], [1], [0], [0], [0, 0, 1, 0], [], []>} : vector<16x64xbf16>, vector<16x64xbf16>, vector<16x16xf32> -> vector<16x16xf32>
    %35 = arith.truncf %34 : vector<16x16xf32> to vector<16x16xbf16>
    %36 = arith.truncf %31 : vector<16x128xf32> to vector<16x128xbf16>
    %cst_19 = arith.constant dense<0.000000e+00> : vector<16x128xf32>
    %37 = tpu.matmul %35, %36, %cst_19 {dimension_numbers = #tpu.dot_dimension_numbers<[1], [0], [0], [1], [0, 0, 1, 1], [], []>} : vector<16x16xbf16>, vector<16x128xbf16>, vector<16x128xf32> -> vector<16x128xf32>
    %38 = arith.mulf %31, %20 : vector<16x128xf32>
    %cst_20 = arith.constant 9.99999997E-7 : f32
    %39 = vector.broadcast %cst_20 : f32 to vector<16x128xf32>
    %40 = arith.addf %37, %39 : vector<16x128xf32>
    %41 = arith.divf %38, %40 : vector<16x128xf32>
    %42 = arith.truncf %41 : vector<16x128xf32> to vector<16x128xbf16>
    %cst_21 = arith.constant dense<0.000000e+00> : vector<16x64xf32>
    %43 = tpu.matmul %42, %16, %cst_21 {dimension_numbers = #tpu.dot_dimension_numbers<[1], [1], [0], [0], [0, 0, 1, 0], [], []>} : vector<16x128xbf16>, vector<64x128xbf16>, vector<16x64xf32> -> vector<16x64xf32>
    %44 = arith.truncf %41 : vector<16x128xf32> to vector<16x128xbf16>
    %45 = arith.truncf %41 : vector<16x128xf32> to vector<16x128xbf16>
    %cst_22 = arith.constant dense<0.000000e+00> : vector<16x16xf32>
    %46 = tpu.matmul %44, %45, %cst_22 {dimension_numbers = #tpu.dot_dimension_numbers<[1], [1], [0], [0], [0, 0, 1, 0], [], []>} : vector<16x128xbf16>, vector<16x128xbf16>, vector<16x16xf32> -> vector<16x16xf32>
    %47 = arith.truncf %46 : vector<16x16xf32> to vector<16x16xbf16>
    %48 = arith.truncf %18 : vector<16x64xf32> to vector<16x64xbf16>
    %cst_23 = arith.constant dense<0.000000e+00> : vector<16x64xf32>
    %49 = tpu.matmul %47, %48, %cst_23 {dimension_numbers = #tpu.dot_dimension_numbers<[1], [0], [0], [1], [0, 0, 1, 1], [], []>} : vector<16x16xbf16>, vector<16x64xbf16>, vector<16x64xf32> -> vector<16x64xf32>
    %50 = arith.mulf %18, %43 : vector<16x64xf32>
    %cst_24 = arith.constant 9.99999997E-7 : f32
    %51 = vector.broadcast %cst_24 : f32 to vector<16x64xf32>
    %52 = arith.addf %49, %51 : vector<16x64xf32>
    %53 = arith.divf %50, %52 : vector<16x64xf32>
    %54 = arith.truncf %53 : vector<16x64xf32> to vector<16x64xbf16>
    %cst_25 = arith.constant dense<0.000000e+00> : vector<16x128xf32>
    %55 = tpu.matmul %54, %16, %cst_25 {dimension_numbers = #tpu.dot_dimension_numbers<[1], [0], [0], [1], [0, 0, 1, 1], [], []>} : vector<16x64xbf16>, vector<64x128xbf16>, vector<16x128xf32> -> vector<16x128xf32>
    %56 = arith.truncf %53 : vector<16x64xf32> to vector<16x64xbf16>
    %57 = arith.truncf %53 : vector<16x64xf32> to vector<16x64xbf16>
    %cst_26 = arith.constant dense<0.000000e+00> : vector<16x16xf32>
    %58 = tpu.matmul %56, %57, %cst_26 {dimension_numbers = #tpu.dot_dimension_numbers<[1], [1], [0], [0], [0, 0, 1, 0], [], []>} : vector<16x64xbf16>, vector<16x64xbf16>, vector<16x16xf32> -> vector<16x16xf32>
    %59 = arith.truncf %58 : vector<16x16xf32> to vector<16x16xbf16>
    %60 = arith.truncf %41 : vector<16x128xf32> to vector<16x128xbf16>
    %cst_27 = arith.constant dense<0.000000e+00> : vector<16x128xf32>
    %61 = tpu.matmul %59, %60, %cst_27 {dimension_numbers = #tpu.dot_dimension_numbers<[1], [0], [0], [1], [0, 0, 1, 1], [], []>} : vector<16x16xbf16>, vector<16x128xbf16>, vector<16x128xf32> -> vector<16x128xf32>
    %62 = arith.mulf %41, %55 : vector<16x128xf32>
    %cst_28 = arith.constant 9.99999997E-7 : f32
    %63 = vector.broadcast %cst_28 : f32 to vector<16x128xf32>
    %64 = arith.addf %61, %63 : vector<16x128xf32>
    %65 = arith.divf %62, %64 : vector<16x128xf32>
    %66 = arith.truncf %65 : vector<16x128xf32> to vector<16x128xbf16>
    %cst_29 = arith.constant dense<0.000000e+00> : vector<16x64xf32>
    %67 = tpu.matmul %66, %16, %cst_29 {dimension_numbers = #tpu.dot_dimension_numbers<[1], [1], [0], [0], [0, 0, 1, 0], [], []>} : vector<16x128xbf16>, vector<64x128xbf16>, vector<16x64xf32> -> vector<16x64xf32>
    %68 = arith.truncf %65 : vector<16x128xf32> to vector<16x128xbf16>
    %69 = arith.truncf %65 : vector<16x128xf32> to vector<16x128xbf16>
    %cst_30 = arith.constant dense<0.000000e+00> : vector<16x16xf32>
    %70 = tpu.matmul %68, %69, %cst_30 {dimension_numbers = #tpu.dot_dimension_numbers<[1], [1], [0], [0], [0, 0, 1, 0], [], []>} : vector<16x128xbf16>, vector<16x128xbf16>, vector<16x16xf32> -> vector<16x16xf32>
    %71 = arith.truncf %70 : vector<16x16xf32> to vector<16x16xbf16>
    %72 = arith.truncf %53 : vector<16x64xf32> to vector<16x64xbf16>
    %cst_31 = arith.constant dense<0.000000e+00> : vector<16x64xf32>
    %73 = tpu.matmul %71, %72, %cst_31 {dimension_numbers = #tpu.dot_dimension_numbers<[1], [0], [0], [1], [0, 0, 1, 1], [], []>} : vector<16x16xbf16>, vector<16x64xbf16>, vector<16x64xf32> -> vector<16x64xf32>
    %74 = arith.mulf %53, %67 : vector<16x64xf32>
    %cst_32 = arith.constant 9.99999997E-7 : f32
    %75 = vector.broadcast %cst_32 : f32 to vector<16x64xf32>
    %76 = arith.addf %73, %75 : vector<16x64xf32>
    %77 = arith.divf %74, %76 : vector<16x64xf32>
    %78 = arith.truncf %77 : vector<16x64xf32> to vector<16x64xbf16>
    %cst_33 = arith.constant dense<0.000000e+00> : vector<16x128xf32>
    %79 = tpu.matmul %78, %16, %cst_33 {dimension_numbers = #tpu.dot_dimension_numbers<[1], [0], [0], [1], [0, 0, 1, 1], [], []>} : vector<16x64xbf16>, vector<64x128xbf16>, vector<16x128xf32> -> vector<16x128xf32>
    %80 = arith.truncf %77 : vector<16x64xf32> to vector<16x64xbf16>
    %81 = arith.truncf %77 : vector<16x64xf32> to vector<16x64xbf16>
    %cst_34 = arith.constant dense<0.000000e+00> : vector<16x16xf32>
    %82 = tpu.matmul %80, %81, %cst_34 {dimension_numbers = #tpu.dot_dimension_numbers<[1], [1], [0], [0], [0, 0, 1, 0], [], []>} : vector<16x64xbf16>, vector<16x64xbf16>, vector<16x16xf32> -> vector<16x16xf32>
    %83 = arith.truncf %82 : vector<16x16xf32> to vector<16x16xbf16>
    %84 = arith.truncf %65 : vector<16x128xf32> to vector<16x128xbf16>
    %cst_35 = arith.constant dense<0.000000e+00> : vector<16x128xf32>
    %85 = tpu.matmul %83, %84, %cst_35 {dimension_numbers = #tpu.dot_dimension_numbers<[1], [0], [0], [1], [0, 0, 1, 1], [], []>} : vector<16x16xbf16>, vector<16x128xbf16>, vector<16x128xf32> -> vector<16x128xf32>
    %86 = arith.mulf %65, %79 : vector<16x128xf32>
    %cst_36 = arith.constant 9.99999997E-7 : f32
    %87 = vector.broadcast %cst_36 : f32 to vector<16x128xf32>
    %88 = arith.addf %85, %87 : vector<16x128xf32>
    %89 = arith.divf %86, %88 : vector<16x128xf32>
    %90 = arith.truncf %89 : vector<16x128xf32> to vector<16x128xbf16>
    %cst_37 = arith.constant dense<0.000000e+00> : vector<16x64xf32>
    %91 = tpu.matmul %90, %16, %cst_37 {dimension_numbers = #tpu.dot_dimension_numbers<[1], [1], [0], [0], [0, 0, 1, 0], [], []>} : vector<16x128xbf16>, vector<64x128xbf16>, vector<16x64xf32> -> vector<16x64xf32>
    %92 = arith.truncf %89 : vector<16x128xf32> to vector<16x128xbf16>
    %93 = arith.truncf %89 : vector<16x128xf32> to vector<16x128xbf16>
    %cst_38 = arith.constant dense<0.000000e+00> : vector<16x16xf32>
    %94 = tpu.matmul %92, %93, %cst_38 {dimension_numbers = #tpu.dot_dimension_numbers<[1], [1], [0], [0], [0, 0, 1, 0], [], []>} : vector<16x128xbf16>, vector<16x128xbf16>, vector<16x16xf32> -> vector<16x16xf32>
    %95 = arith.truncf %94 : vector<16x16xf32> to vector<16x16xbf16>
    %96 = arith.truncf %77 : vector<16x64xf32> to vector<16x64xbf16>
    %cst_39 = arith.constant dense<0.000000e+00> : vector<16x64xf32>
    %97 = tpu.matmul %95, %96, %cst_39 {dimension_numbers = #tpu.dot_dimension_numbers<[1], [0], [0], [1], [0, 0, 1, 1], [], []>} : vector<16x16xbf16>, vector<16x64xbf16>, vector<16x64xf32> -> vector<16x64xf32>
    %98 = arith.mulf %77, %91 : vector<16x64xf32>
    %cst_40 = arith.constant 9.99999997E-7 : f32
    %99 = vector.broadcast %cst_40 : f32 to vector<16x64xf32>
    %100 = arith.addf %97, %99 : vector<16x64xf32>
    %101 = arith.divf %98, %100 : vector<16x64xf32>
    %102 = arith.truncf %101 : vector<16x64xf32> to vector<16x64xbf16>
    %cst_41 = arith.constant dense<0.000000e+00> : vector<16x128xf32>
    %103 = tpu.matmul %102, %16, %cst_41 {dimension_numbers = #tpu.dot_dimension_numbers<[1], [0], [0], [1], [0, 0, 1, 1], [], []>} : vector<16x64xbf16>, vector<64x128xbf16>, vector<16x128xf32> -> vector<16x128xf32>
    %104 = arith.truncf %101 : vector<16x64xf32> to vector<16x64xbf16>
    %105 = arith.truncf %101 : vector<16x64xf32> to vector<16x64xbf16>
    %cst_42 = arith.constant dense<0.000000e+00> : vector<16x16xf32>
    %106 = tpu.matmul %104, %105, %cst_42 {dimension_numbers = #tpu.dot_dimension_numbers<[1], [1], [0], [0], [0, 0, 1, 0], [], []>} : vector<16x64xbf16>, vector<16x64xbf16>, vector<16x16xf32> -> vector<16x16xf32>
    %107 = arith.truncf %106 : vector<16x16xf32> to vector<16x16xbf16>
    %108 = arith.truncf %89 : vector<16x128xf32> to vector<16x128xbf16>
    %cst_43 = arith.constant dense<0.000000e+00> : vector<16x128xf32>
    %109 = tpu.matmul %107, %108, %cst_43 {dimension_numbers = #tpu.dot_dimension_numbers<[1], [0], [0], [1], [0, 0, 1, 1], [], []>} : vector<16x16xbf16>, vector<16x128xbf16>, vector<16x128xf32> -> vector<16x128xf32>
    %110 = arith.mulf %89, %103 : vector<16x128xf32>
    %cst_44 = arith.constant 9.99999997E-7 : f32
    %111 = vector.broadcast %cst_44 : f32 to vector<16x128xf32>
    %112 = arith.addf %109, %111 : vector<16x128xf32>
    %113 = arith.divf %110, %112 : vector<16x128xf32>
    %114 = arith.truncf %113 : vector<16x128xf32> to vector<16x128xbf16>
    %cst_45 = arith.constant dense<0.000000e+00> : vector<16x64xf32>
    %115 = tpu.matmul %114, %16, %cst_45 {dimension_numbers = #tpu.dot_dimension_numbers<[1], [1], [0], [0], [0, 0, 1, 0], [], []>} : vector<16x128xbf16>, vector<64x128xbf16>, vector<16x64xf32> -> vector<16x64xf32>
    %116 = arith.truncf %113 : vector<16x128xf32> to vector<16x128xbf16>
    %117 = arith.truncf %113 : vector<16x128xf32> to vector<16x128xbf16>
    %cst_46 = arith.constant dense<0.000000e+00> : vector<16x16xf32>
    %118 = tpu.matmul %116, %117, %cst_46 {dimension_numbers = #tpu.dot_dimension_numbers<[1], [1], [0], [0], [0, 0, 1, 0], [], []>} : vector<16x128xbf16>, vector<16x128xbf16>, vector<16x16xf32> -> vector<16x16xf32>
    %119 = arith.truncf %118 : vector<16x16xf32> to vector<16x16xbf16>
    %120 = arith.truncf %101 : vector<16x64xf32> to vector<16x64xbf16>
    %cst_47 = arith.constant dense<0.000000e+00> : vector<16x64xf32>
    %121 = tpu.matmul %119, %120, %cst_47 {dimension_numbers = #tpu.dot_dimension_numbers<[1], [0], [0], [1], [0, 0, 1, 1], [], []>} : vector<16x16xbf16>, vector<16x64xbf16>, vector<16x64xf32> -> vector<16x64xf32>
    %122 = arith.mulf %101, %115 : vector<16x64xf32>
    %cst_48 = arith.constant 9.99999997E-7 : f32
    %123 = vector.broadcast %cst_48 : f32 to vector<16x64xf32>
    %124 = arith.addf %121, %123 : vector<16x64xf32>
    %125 = arith.divf %122, %124 : vector<16x64xf32>
    %126 = arith.truncf %125 : vector<16x64xf32> to vector<16x64xbf16>
    %cst_49 = arith.constant dense<0.000000e+00> : vector<16x128xf32>
    %127 = tpu.matmul %126, %16, %cst_49 {dimension_numbers = #tpu.dot_dimension_numbers<[1], [0], [0], [1], [0, 0, 1, 1], [], []>} : vector<16x64xbf16>, vector<64x128xbf16>, vector<16x128xf32> -> vector<16x128xf32>
    %128 = arith.truncf %125 : vector<16x64xf32> to vector<16x64xbf16>
    %129 = arith.truncf %125 : vector<16x64xf32> to vector<16x64xbf16>
    %cst_50 = arith.constant dense<0.000000e+00> : vector<16x16xf32>
    %130 = tpu.matmul %128, %129, %cst_50 {dimension_numbers = #tpu.dot_dimension_numbers<[1], [1], [0], [0], [0, 0, 1, 0], [], []>} : vector<16x64xbf16>, vector<16x64xbf16>, vector<16x16xf32> -> vector<16x16xf32>
    %131 = arith.truncf %130 : vector<16x16xf32> to vector<16x16xbf16>
    %132 = arith.truncf %113 : vector<16x128xf32> to vector<16x128xbf16>
    %cst_51 = arith.constant dense<0.000000e+00> : vector<16x128xf32>
    %133 = tpu.matmul %131, %132, %cst_51 {dimension_numbers = #tpu.dot_dimension_numbers<[1], [0], [0], [1], [0, 0, 1, 1], [], []>} : vector<16x16xbf16>, vector<16x128xbf16>, vector<16x128xf32> -> vector<16x128xf32>
    %134 = arith.mulf %113, %127 : vector<16x128xf32>
    %cst_52 = arith.constant 9.99999997E-7 : f32
    %135 = vector.broadcast %cst_52 : f32 to vector<16x128xf32>
    %136 = arith.addf %133, %135 : vector<16x128xf32>
    %137 = arith.divf %134, %136 : vector<16x128xf32>
    %138 = arith.truncf %137 : vector<16x128xf32> to vector<16x128xbf16>
    %cst_53 = arith.constant dense<0.000000e+00> : vector<16x64xf32>
    %139 = tpu.matmul %138, %16, %cst_53 {dimension_numbers = #tpu.dot_dimension_numbers<[1], [1], [0], [0], [0, 0, 1, 0], [], []>} : vector<16x128xbf16>, vector<64x128xbf16>, vector<16x64xf32> -> vector<16x64xf32>
    %140 = arith.truncf %137 : vector<16x128xf32> to vector<16x128xbf16>
    %141 = arith.truncf %137 : vector<16x128xf32> to vector<16x128xbf16>
    %cst_54 = arith.constant dense<0.000000e+00> : vector<16x16xf32>
    %142 = tpu.matmul %140, %141, %cst_54 {dimension_numbers = #tpu.dot_dimension_numbers<[1], [1], [0], [0], [0, 0, 1, 0], [], []>} : vector<16x128xbf16>, vector<16x128xbf16>, vector<16x16xf32> -> vector<16x16xf32>
    %143 = arith.truncf %142 : vector<16x16xf32> to vector<16x16xbf16>
    %144 = arith.truncf %125 : vector<16x64xf32> to vector<16x64xbf16>
    %cst_55 = arith.constant dense<0.000000e+00> : vector<16x64xf32>
    %145 = tpu.matmul %143, %144, %cst_55 {dimension_numbers = #tpu.dot_dimension_numbers<[1], [0], [0], [1], [0, 0, 1, 1], [], []>} : vector<16x16xbf16>, vector<16x64xbf16>, vector<16x64xf32> -> vector<16x64xf32>
    %146 = arith.mulf %125, %139 : vector<16x64xf32>
    %cst_56 = arith.constant 9.99999997E-7 : f32
    %147 = vector.broadcast %cst_56 : f32 to vector<16x64xf32>
    %148 = arith.addf %145, %147 : vector<16x64xf32>
    %149 = arith.divf %146, %148 : vector<16x64xf32>
    %150 = arith.truncf %149 : vector<16x64xf32> to vector<16x64xbf16>
    %cst_57 = arith.constant dense<0.000000e+00> : vector<16x128xf32>
    %151 = tpu.matmul %150, %16, %cst_57 {dimension_numbers = #tpu.dot_dimension_numbers<[1], [0], [0], [1], [0, 0, 1, 1], [], []>} : vector<16x64xbf16>, vector<64x128xbf16>, vector<16x128xf32> -> vector<16x128xf32>
    %152 = arith.truncf %149 : vector<16x64xf32> to vector<16x64xbf16>
    %153 = arith.truncf %149 : vector<16x64xf32> to vector<16x64xbf16>
    %cst_58 = arith.constant dense<0.000000e+00> : vector<16x16xf32>
    %154 = tpu.matmul %152, %153, %cst_58 {dimension_numbers = #tpu.dot_dimension_numbers<[1], [1], [0], [0], [0, 0, 1, 0], [], []>} : vector<16x64xbf16>, vector<16x64xbf16>, vector<16x16xf32> -> vector<16x16xf32>
    %155 = arith.truncf %154 : vector<16x16xf32> to vector<16x16xbf16>
    %156 = arith.truncf %137 : vector<16x128xf32> to vector<16x128xbf16>
    %cst_59 = arith.constant dense<0.000000e+00> : vector<16x128xf32>
    %157 = tpu.matmul %155, %156, %cst_59 {dimension_numbers = #tpu.dot_dimension_numbers<[1], [0], [0], [1], [0, 0, 1, 1], [], []>} : vector<16x16xbf16>, vector<16x128xbf16>, vector<16x128xf32> -> vector<16x128xf32>
    %158 = arith.mulf %137, %151 : vector<16x128xf32>
    %cst_60 = arith.constant 9.99999997E-7 : f32
    %159 = vector.broadcast %cst_60 : f32 to vector<16x128xf32>
    %160 = arith.addf %157, %159 : vector<16x128xf32>
    %161 = arith.divf %158, %160 : vector<16x128xf32>
    %162 = arith.truncf %161 : vector<16x128xf32> to vector<16x128xbf16>
    %cst_61 = arith.constant dense<0.000000e+00> : vector<16x64xf32>
    %163 = tpu.matmul %162, %16, %cst_61 {dimension_numbers = #tpu.dot_dimension_numbers<[1], [1], [0], [0], [0, 0, 1, 0], [], []>} : vector<16x128xbf16>, vector<64x128xbf16>, vector<16x64xf32> -> vector<16x64xf32>
    %164 = arith.truncf %161 : vector<16x128xf32> to vector<16x128xbf16>
    %165 = arith.truncf %161 : vector<16x128xf32> to vector<16x128xbf16>
    %cst_62 = arith.constant dense<0.000000e+00> : vector<16x16xf32>
    %166 = tpu.matmul %164, %165, %cst_62 {dimension_numbers = #tpu.dot_dimension_numbers<[1], [1], [0], [0], [0, 0, 1, 0], [], []>} : vector<16x128xbf16>, vector<16x128xbf16>, vector<16x16xf32> -> vector<16x16xf32>
    %167 = arith.truncf %166 : vector<16x16xf32> to vector<16x16xbf16>
    %168 = arith.truncf %149 : vector<16x64xf32> to vector<16x64xbf16>
    %cst_63 = arith.constant dense<0.000000e+00> : vector<16x64xf32>
    %169 = tpu.matmul %167, %168, %cst_63 {dimension_numbers = #tpu.dot_dimension_numbers<[1], [0], [0], [1], [0, 0, 1, 1], [], []>} : vector<16x16xbf16>, vector<16x64xbf16>, vector<16x64xf32> -> vector<16x64xf32>
    %170 = arith.mulf %149, %163 : vector<16x64xf32>
    %cst_64 = arith.constant 9.99999997E-7 : f32
    %171 = vector.broadcast %cst_64 : f32 to vector<16x64xf32>
    %172 = arith.addf %169, %171 : vector<16x64xf32>
    %173 = arith.divf %170, %172 : vector<16x64xf32>
    %174 = arith.truncf %173 : vector<16x64xf32> to vector<16x64xbf16>
    %cst_65 = arith.constant dense<0.000000e+00> : vector<16x128xf32>
    %175 = tpu.matmul %174, %16, %cst_65 {dimension_numbers = #tpu.dot_dimension_numbers<[1], [0], [0], [1], [0, 0, 1, 1], [], []>} : vector<16x64xbf16>, vector<64x128xbf16>, vector<16x128xf32> -> vector<16x128xf32>
    %176 = arith.truncf %173 : vector<16x64xf32> to vector<16x64xbf16>
    %177 = arith.truncf %173 : vector<16x64xf32> to vector<16x64xbf16>
    %cst_66 = arith.constant dense<0.000000e+00> : vector<16x16xf32>
    %178 = tpu.matmul %176, %177, %cst_66 {dimension_numbers = #tpu.dot_dimension_numbers<[1], [1], [0], [0], [0, 0, 1, 0], [], []>} : vector<16x64xbf16>, vector<16x64xbf16>, vector<16x16xf32> -> vector<16x16xf32>
    %179 = arith.truncf %178 : vector<16x16xf32> to vector<16x16xbf16>
    %180 = arith.truncf %161 : vector<16x128xf32> to vector<16x128xbf16>
    %cst_67 = arith.constant dense<0.000000e+00> : vector<16x128xf32>
    %181 = tpu.matmul %179, %180, %cst_67 {dimension_numbers = #tpu.dot_dimension_numbers<[1], [0], [0], [1], [0, 0, 1, 1], [], []>} : vector<16x16xbf16>, vector<16x128xbf16>, vector<16x128xf32> -> vector<16x128xf32>
    %182 = arith.mulf %161, %175 : vector<16x128xf32>
    %cst_68 = arith.constant 9.99999997E-7 : f32
    %183 = vector.broadcast %cst_68 : f32 to vector<16x128xf32>
    %184 = arith.addf %181, %183 : vector<16x128xf32>
    %185 = arith.divf %182, %184 : vector<16x128xf32>
    %cst_69 = arith.constant 0.000000e+00 : f32
    %186 = vector.broadcast %cst_69 : f32 to vector<16x128xf32>
    %187 = arith.select %6, %185, %186 : vector<16x128xi1>, vector<16x128xf32>
    %188 = arith.truncf %173 : vector<16x64xf32> to vector<16x64xbf16>
    %189 = arith.truncf %187 : vector<16x128xf32> to vector<16x128xbf16>
    %cst_70 = arith.constant dense<0.000000e+00> : vector<64x128xf32>
    %190 = tpu.matmul %188, %189, %cst_70 {dimension_numbers = #tpu.dot_dimension_numbers<[0], [0], [1], [1], [0, 1, 1, 1], [], []>} : vector<16x64xbf16>, vector<16x128xbf16>, vector<64x128xf32> -> vector<64x128xf32>
    %191 = arith.truncf %2 : vector<64x64xf32> to vector<64x64xbf16>
    %192 = arith.truncf %190 : vector<64x128xf32> to vector<64x128xbf16>
    %cst_71 = arith.constant dense<0.000000e+00> : vector<64x128xf32>
    %193 = tpu.matmul %191, %192, %cst_71 {dimension_numbers = #tpu.dot_dimension_numbers<[1], [0], [0], [1], [0, 0, 1, 1], [], []>} : vector<64x64xbf16>, vector<64x128xbf16>, vector<64x128xf32> -> vector<64x128xf32>
    %194 = vector.broadcast %3 : vector<64x1xf32> to vector<64x128xf32>
    %195 = arith.addf %193, %194 : vector<64x128xf32>
    %c0_72 = arith.constant 0 : index
    %c0_73 = arith.constant 0 : index
    %c0_74 = arith.constant 0 : index
    %196 = vector.load %arg1[%c0_72, %c0_73, %c0_74] : memref<1x64x128xf32, #tpu.memory_space<vmem>>, vector<1x64x128xf32>
    %197 = vector.shape_cast %196 : vector<1x64x128xf32> to vector<64x128xf32>
    %198 = arith.addf %197, %195 : vector<64x128xf32>
    %cst_75 = arith.constant 0.000000e+00 : f32
    %199 = vector.broadcast %cst_75 : f32 to vector<64x128xf32>
    %200 = arith.maximumf %198, %199 : vector<64x128xf32>
    %c0_76 = arith.constant 0 : index
    %c0_77 = arith.constant 0 : index
    %c0_78 = arith.constant 0 : index
    %201 = vector.load %arg7[%c0_76, %c0_77, %c0_78] : memref<1x64x128xf32, #tpu.memory_space<vmem>>, vector<1x64x128xf32>
    %202 = vector.shape_cast %201 : vector<1x64x128xf32> to vector<64x128xf32>
    %203 = vector.shape_cast %200 : vector<64x128xf32> to vector<1x64x128xf32>
    tpu.vector_store %arg7[%c0_76, %c0_77, %c0_78], %203 {strides = array<i32>} : memref<1x64x128xf32, #tpu.memory_space<vmem>>, vector<1x64x128xf32>,
    return
  }
  func.func @transform_0(%arg0: i32) -> (i32, i32, i32) {
    %c0_i32 = arith.constant 0 : i32
    %c0_i32_0 = arith.constant 0 : i32
    %c0_i32_1 = arith.constant 0 : i32
    return %arg0, %c0_i32, %c0_i32_0 : i32, i32, i32
  }
  func.func @transform_1(%arg0: i32) -> (i32, i32) {
    %c0_i32 = arith.constant 0 : i32
    %c0_i32_0 = arith.constant 0 : i32
    %c0_i32_1 = arith.constant 0 : i32
    return %c0_i32, %c0_i32_0 : i32, i32
  }
  func.func @transform_2(%arg0: i32) -> (i32, i32) {
    %c0_i32 = arith.constant 0 : i32
    %c0_i32_0 = arith.constant 0 : i32
    %c0_i32_1 = arith.constant 0 : i32
    return %c0_i32, %c0_i32_0 : i32, i32
  }
  func.func @transform_3(%arg0: i32) -> (i32, i32) {
    %c0_i32 = arith.constant 0 : i32
    %c0_i32_0 = arith.constant 0 : i32
    %c0_i32_1 = arith.constant 0 : i32
    return %c0_i32, %c0_i32_0 : i32, i32
  }
  func.func @transform_4(%arg0: i32) -> (i32, i32) {
    %c0_i32 = arith.constant 0 : i32
    %c0_i32_0 = arith.constant 0 : i32
    %c0_i32_1 = arith.constant 0 : i32
    return %c0_i32, %c0_i32_0 : i32, i32
  }
  func.func @transform_5(%arg0: i32) -> (i32, i32, i32) {
    %c0_i32 = arith.constant 0 : i32
    %c0_i32_0 = arith.constant 0 : i32
    %c0_i32_1 = arith.constant 0 : i32
    return %arg0, %c0_i32, %c0_i32_0 : i32, i32, i32
  }
  func.func @transform_6(%arg0: i32) -> (i32, i32, i32) {
    %c0_i32 = arith.constant 0 : i32
    %c0_i32_0 = arith.constant 0 : i32
    %c0_i32_1 = arith.constant 0 : i32
    return %arg0, %c0_i32, %c0_i32_0 : i32, i32, i32
  }
}

</mosaic_0001>

<bundles_post_ra>
// kernel: tpu_custom_call.1
= control target key start
LH: loop header
LB: loop body
LE: loop exit
PB: predicated region body
PF: predicated region fallthrough
CT: control target
= control target key end

     0   :  { %s4234_s0 = inlined_call_operand.vmem [shape: f32[2,64,128], index: 0, kind: input, shape index: {}]   ;;  %s4235_s1 = inlined_call_operand.hbm [shape: f32[64,64], index: 1, kind: input, shape index: {}]   ;;  %s4236_s2 = inlined_call_operand.vmem [shape: f32[64,1], index: 2, kind: input, shape index: {}]   ;;  %s4237_s3 = inlined_call_operand.hbm [shape: f32[64,64], index: 3, kind: input, shape index: {}]   ;;  %s4238_s4 = inlined_call_operand.vmem [shape: f32[64,1], index: 4, kind: input, shape index: {}]   ;;  %s4239_s5 = inlined_call_operand.hbm [shape: f32[2,16,64], index: 5, kind: input, shape index: {}]   ;;  %s4240_s6 = inlined_call_operand.hbm [shape: f32[2,64,128], index: 6, kind: output, shape index: {}]  }
   0x1   :  { %4245 = sst [smem:[#allocation14_spill]] %s4235_s1 }
   0x2   :  { %11 = vsyncpa [#allocation3], 0 }
   0x3   :  { %12 = vsyncpa [#allocation6], 0 }
   0x4   :  { %13 = vsyncpa [#allocation4], 0 }
   0x5   :  { %15 = vsyncpa [#allocation4 + $0x1], 0  ;;  %s3556_s21 = smov 0   ;;  %s3558_s22 = smov 0  }
   0x6   :  { %s3560_s23 = smov 0   ;;  %s3562_s24 = smov 0  }
   0x7 LB: > { %s3577_s25 = sadd.s32 4294967295, %s3508_s24   ;;  %s2654_s26 = sadd.s32 4294967294, %s3508_s24   ;;  %s3508_s24 = sphi %s3562_s24, %s4270_s24   ;;  %s3504_s23 = sphi %s3560_s23, %s4269_s23   ;;  %s3500_s22 = sphi %s3558_s22, %s4268_s22   ;;  %s3496_s21 = sphi %s3556_s21, %s4267_s21  }
   0x8   : > { %s3581_s27 = sadd.s32 1, %s3508_s24   ;;  %s138_s28 = sadd.s32 1, %s3504_s23 }
   0x9   : > { %s135_s29 = ssub.s32 %s3508_s24, %s3581_s27  ;;  %p145_p0 = scmp.ne.s32.totalorder %s3504_s23, %s3500_s22 }
   0xa   : > { %p136_p1 = scmp.eq.s32.totalorder %s135_s29, 0  ;;  %p146_p2 = scmp.eq.s32.totalorder %s3508_s24, 0 }
   0xb   : > { %p151_p3 = scmp.ne.s32.totalorder %s3500_s22, %s3496_s21  ;;  %p4242_p4 = scmp.eq.s32.totalorder %s3577_s25, 0 }
   0xc   : > { %s3593_s30 = scalar_select %p136_p1, %s3504_s23, %s138_s28  }
   0xd   : > { %p3595_p5 = por %p146_p2, %p145_p0  ;;  %p3601_p6 = por %p4242_p4, %p151_p3 }
   0xe   : > { %4246 = sst [smem:[#allocation13_spill]] %s3593_s30  ;;  %p175_p7 = scmp.eq.s32.totalorder %s3577_s25, 1 }
   0xf   : > { %s4248_s8 = scalar_select %p3601_p6, 1, 0 }
  0x10   : > { %p181_p8 = scmp.eq.s32.totalorder %s2654_s26, 1  ;;  %p2655_p9 = scmp.ge.s32.totalorder %s3508_s24, 1 }
  0x11   : > { %p188_p10 = scmp.lt.s32.totalorder %s3508_s24, 3  ;;  %p3608_p11 = por %p175_p7, %p145_p0 }
  0x12   : > { %p3612_p12 = por %p181_p8, %p151_p3  ;;  %s3510_s12 = smov [#allocation2]  }
  0x13   : > { %s4249_s9 = scalar_select %p3608_p11, 1, 0 }
  0x14   : > { %s4250_s10 = scalar_select %p3612_p12, 1, 0 }
  0x15   : > { %p3616_p13 = pnand %p2655_p9, %p188_p10  ;;  %s200_s13 = sshll.u32 %s3510_s12, 4  ;;  %s201_s13 = int_to_ptr.vmem [resolvable:$true] %s200_s13 }
  0x16   : > { %p3243_p3 = scmp.lt.s32.totalorder %s3508_s24, 2  ;;  %s3511_s15 = smov [#allocation5]  }
  0x17   : > { %s4251_s11 = scalar_select %p3616_p13, 1, 0 }
  0x18   : > { %p3226_p1 = pneg %p3616_p13  ;;  %s216_s16 = sshll.u32 %s3511_s15, 4  ;;  %s217_s16 = int_to_ptr.vmem [resolvable:$true] %s216_s16 }
  0x19   : > { %s3367_s17 = scalar_lea.vmem %s201_s13, 1024  ;;  %p3375_p12 = scmp.lt.s32.totalorder %s201_s13, %s201_s13 }
  0x1a   : > { %p3624_p2 = pnand %p3226_p1, %p4242_p4  ;;  %p3368_p8 = scmp.ne.s32.totalorder %s201_s13, %s3367_s17 }
  0x1b   : > { %p3376_p11 = scmp.lt.s32.totalorder %s3367_s17, %s3367_s17 }
  0x1c   : > { %p3358_p7 = pneg %p3624_p2 }
  0x1d   : > { %p3377_p1 = por %p3376_p11, %p3375_p12 }
  0x1e   : > { %p3370_p9 = pnand %p3368_p8, %p3358_p7 }
  0x20   : > { %p3371_p10 = pneg %p3370_p9 }
  0x22   : > { %p3378_p4 = pnand %p3377_p1, %p3371_p10 }
  0x24   : > { %3381 = shalt.err (!%p3378_p4)
}
  0x25   : > { %s3512_s18 = smov 128   ;;  %s3513_s19 = smov 8  }
  0x26   : > { %s4253_s1 = sld [smem:[#allocation14_spill]]  ;;  %p3647_p8 = pnand %p3243_p3, %p3595_p5 }
  0x27   : > { %s3393_s29 = scalar_lea.vmem %s217_s16, 1024  ;;  %p3401_p9 = scmp.lt.s32.totalorder %s217_s16, %s217_s16 }
  0x28   : > { %p3394_p4 = scmp.ne.s32.totalorder %s217_s16, %s3393_s29  ;;  %p3402_p10 = scmp.lt.s32.totalorder %s3393_s29, %s3393_s29 }
  0x2a   : > { %p3396_p11 = pnand %p3394_p4, %p3358_p7  ;;  %p3403_p1 = por %p3402_p10, %p3401_p9 }
  0x2c   : > { %3229 = dma.hbm_to_vmem [thread:$0]  (!%p3624_p2), %s4253_s1, 1024, %s201_s13, [#allocation3], %s3512_s18, %s3512_s18, %s3513_s19  }
  0x2d   : > { %p3397_p12 = pneg %p3396_p11 }
  0x2f   : > { %p3404_p0 = pnand %p3403_p1, %p3397_p12 }
  0x31   : > { %3407 = shalt.err (!%p3404_p0)
}
  0x32   : > { %3232 = dma.hbm_to_vmem [thread:$0]  (!%p3624_p2), %s4237_s3, 1024, %s217_s16, [#allocation6], %s3512_s18, %s3512_s18, %s3513_s19  }
  0x33   : > { %s241_s13 = sand.u32 1, %s3508_s24   ;;  %s243_s15 = sand.u32 1, %s3504_s23  }
  0x34   : > { %s2659_s17 = sshll.u32 %s243_s15, 4  ;;  %s2719_s20 = sshll.u32 %s3508_s24, 8 }
  0x35   : > { %s3668_s1 = scalar_lea.hbm %s4239_s5, %s2719_s20  ;;  %s245_s14 = scalar_lea.vmem [#allocation7], %s2659_s17 }
  0x36   : > { %s252_s30 = sshll.u32 %s245_s14, 4  ;;  %s3672_s7 = scalar_lea.sflag [#allocation3], %s241_s13  ;;  %s3670_s30 = int_to_ptr.vmem [resolvable:$true] %s252_s30 }
  0x37   : > { %s3408_s12 = scalar_lea.hbm %s3668_s1, 256  ;;  %p3410_p2 = pneg %p3647_p8 }
  0x38   : > { %p3409_p5 = scmp.ne.s32.totalorder %s3668_s1, %s3408_s12  ;;  %s3413_s20 = scalar_lea.hbm %s4239_s5, 512 }
  0x39   : > { %p3414_p7 = scmp.lt.s32.totalorder %s3668_s1, %s4239_s5  ;;  %p3415_p4 = scmp.lt.s32.totalorder %s3413_s20, %s3408_s12 }
  0x3a   : > { %p3411_p0 = pnand %p3410_p2, %p3409_p5 }
  0x3b   : > { %p3416_p11 = por %p3415_p4, %p3414_p7 }
  0x3c   : > { %p3412_p3 = pneg %p3411_p0 }
  0x3e   : > { %p3417_p12 = pnand %p3416_p11, %p3412_p3 }
  0x40   : > { %3420 = shalt.err (!%p3417_p12)
}
  0x41   : > { %s3421_s13 = scalar_lea.vmem %s3670_s30, 256  ;;  %s3514_s17 = smov [#allocation7]  }
  0x42   : > { %p3422_p9 = scmp.ne.s32.totalorder %s3670_s30, %s3421_s13  ;;  %s3426_s14 = sshll.u32 %s3514_s17, 4  ;;  %s3427_s14 = int_to_ptr.vmem [resolvable:$false] %s3426_s14 }
  0x43   : > { %s3428_s16 = scalar_lea.vmem %s3427_s14, 512  ;;  %p3429_p5 = scmp.lt.s32.totalorder %s3670_s30, %s3427_s14 }
  0x44   : > { %p3424_p10 = pnand %p3422_p9, %p3410_p2  ;;  %p3430_p0 = scmp.lt.s32.totalorder %s3428_s16, %s3421_s13 }
  0x46   : > { %p3425_p1 = pneg %p3424_p10  ;;  %p3431_p6 = por %p3430_p0, %p3429_p5 }
  0x48   : > { %p3432_p13 = pnand %p3431_p6, %p3425_p1 }
  0x4a   : > { %3435 = shalt.err (!%p3432_p13)
}
  0x4b   : > { %3236 = dma.hbm_to_vmem [thread:$0]  (!%p3647_p8), %s3668_s1, 256, %s3670_s30, %s3672_s7, %s3512_s18, %s3512_s18, %s3513_s19  }
  0x4c   : > { %p4255_p2 = scmp.ne.s32.totalorder %s4251_s11, 0 }
  0x4d   : > { %p4256_p3 = scmp.eq.s32.totalorder (!%p4255_p2), %s3577_s25, 0 }
  0x4e   : > { %264 = sbr.rel (%p4255_p2) target bundleno = 6361 (0x18d9), region = 44 }
  0x53   : > { %3479 = dma.done.wait (%p4256_p3), [#allocation3], 1024   ;;  %p4257_p7 = pmov %p4256_p3 }
  0x54   : > { %p4258_p6 = pmov %p4256_p3 }
  0x55   : > { %3481 = vsyncadd (%p4257_p7), [#allocation3], 4294966272 }
  0x56   : > { %3483 = dma.done.wait (%p4258_p6), [#allocation6], 1024   ;;  %p4259_p13 = pmov %p4256_p3 }
  0x57   : > { %s274_s28 = sand.u32 1, %s3577_s25   ;;  %s3708_s1 = sand.u32 1, %s3500_s22  }
  0x58   : > { %3485 = vsyncadd (%p4259_p13), [#allocation6], 4294966272  ;;  %s2665_s30 = sshll.u32 %s3708_s1, 4  ;;  %s275_s11 = scalar_lea.sflag [#allocation3], %s274_s28 }
  0x59   : > { %s3711_s18 = scalar_lea.vmem [#allocation7], %s2665_s30  ;;  %p4260_p8 = scmp.ne.s32.totalorder %s4248_s8, 0 }
  0x5b   : > { %3487 = dma.done.wait (%p4260_p8), %s275_s11, 256  }
  0x5c   : > { %3489 = vsyncadd (%p4260_p8), %s275_s11, 4294967040  ;;  %p312_p4 = scmp.lt.s32.totalorder %s3577_s25, 1  ;;  %v3515_v0 = vmov 0   ;;  %v318_v9 = vld [vmem:[#allocation2] sm:$0xff]  ;;  %v319_v10 = vld [vmem:[#allocation2 + $0x8] sm:$0xff]  ;;  %vm409_vm0 = vcmask 523264  }
  0x5d   : > { %3289 = vset.pattern.permute.xlu1 %v3515_v0  ;;  %3288 = vset.pattern.permute.xlu0 %v3515_v0  ;;  %v361_v11 = vpack.c.bf16 %v319_v10, %v318_v9  ;;  %v330_v13 = vld [vmem:[%s4236_s2 + $0x20] sm:$0xff]  ;;  %v331_v16 = vld [vmem:[%s4236_s2 + $0x28] sm:$0xff]  ;;  %v332_v17 = vld [vmem:[%s4236_s2 + $0x30] sm:$0xff]  ;;  %v3516_v41 = vmov 0.0   ;;  %vm3517_vm1 = vmmov 0   ;;  %vm616_vm4 = vcmask 130048  }
  0x5e   : > { %s313_s19 = scalar_select %p312_p4, %s3577_s25, 1  ;;  %391 = vperm.xlu1 %3289, %v330_v13   ;;  %401 = vperm.xlu0 %3288, %v332_v17   ;;  %v333_v19 = vld [vmem:[%s4236_s2 + $0x38] sm:$0xff]  ;;  %v320_v21 = vld [vmem:[#allocation2 + $0x10] sm:$0xff]  ;;  %v322_v23 = vld [vmem:[#allocation2 + $0x20] sm:$0xff] }
  0x5f   : > { %2868 = vmatprep.mubr.msk.bf16.mxu0 %vm409_vm0, %v361_v11  ;;  %v329_v20 = vld [vmem:[%s4236_s2 + $0x18] sm:$0xff]  ;;  %v323_v24 = vld [vmem:[#allocation2 + $0x28] sm:$0xff]  ;;  %v328_v25 = vld [vmem:[%s4236_s2 + $0x10] sm:$0xff]  ;;  %2876 = vmatprep.subr.bf16.mxu1 %v3516_v41  ;;  %s2721_s16 = sshll.u32 %s3577_s25, 10  ;;  %p4263_p12 = scmp.ne.s32.totalorder %s4249_s9, 0 }
  0x60   : > { %s2720_s7 = sshll.u32 %s313_s19, 6  ;;  %v321_v22 = vld [vmem:[#allocation2 + $0x18] sm:$0xff]  ;;  %v327_v27 = vld [vmem:[%s4236_s2 + $0x8] sm:$0xff]  ;;  %v363_v28 = vpack.c.bf16 %v323_v24, %v322_v23  ;;  %v326_v29 = vld [vmem:[%s4236_s2] sm:$0xff]  ;;  %2884 = vmatprep.mubr.msk.bf16.mxu1 %vm3517_vm1, %v3516_v41  ;;  %s4189_s11 = scalar_lea.hbm %s4240_s6, %s2721_s16 }
  0x61   : > { %s3722_s20 = scalar_lea.vmem %s4234_s0, %s2720_s7  ;;  %v362_v26 = vpack.c.bf16 %v321_v22, %v320_v21  ;;  %v342_v30 = vld [vmem:[%s4238_s4] sm:$0xff]  ;;  %v324_v31 = vld [vmem:[#allocation2 + $0x30] sm:$0xff]  ;;  %v325_v32 = vld [vmem:[#allocation2 + $0x38] sm:$0xff]  ;;  %s2537_s19 = scalar_lea.sflag [#allocation4], %s3708_s1 }
  0x62   : > { %v359_v1 = vld [vmem:[%s3722_s20 + $0x30] sm:$0xff]  ;;  %v360_v2 = vld [vmem:[%s3722_s20 + $0x38] sm:$0xff]  ;;  %v357_v3 = vld [vmem:[%s3722_s20 + $0x20] sm:$0xff]  ;;  %396 = vperm.xlu1 %3289, %v331_v16   ;;  %406 = vperm.xlu0 %3288, %v333_v19   ;;  %v364_v33 = vpack.c.bf16 %v325_v32, %v324_v31  ;;  %s3518_s25 = smov [#allocation8]  }
  0x63   : > { %v368_v4 = vpack.c.bf16 %v360_v2, %v359_v1  ;;  %v358_v5 = vld [vmem:[%s3722_s20 + $0x28] sm:$0xff]  ;;  %v355_v7 = vld [vmem:[%s3722_s20 + $0x10] sm:$0xff]  ;;  %v356_v8 = vld [vmem:[%s3722_s20 + $0x18] sm:$0xff]  ;;  %s3440_s12 = sshll.u32 %s3518_s25, 4  ;;  %s3441_s12 = int_to_ptr.vmem [resolvable:$false] %s3440_s12 }
  0x64   : > { %v367_v6 = vpack.c.bf16 %v358_v5, %v357_v3  ;;  %v366_v12 = vpack.c.bf16 %v356_v8, %v355_v7  ;;  %v353_v14 = vld [vmem:[%s3722_s20] sm:$0xff]  ;;  %v354_v15 = vld [vmem:[%s3722_s20 + $0x8] sm:$0xff]  ;;  %v344_v35 = vld [vmem:[%s4238_s4 + $0x10] sm:$0xff]  ;;  %s3442_s15 = scalar_lea.vmem %s3441_s12, 2048 }
  0x65   : > { %2860 = vmatprep.subr.bf16.mxu0 %v368_v4  ;;  %v365_v18 = vpack.c.bf16 %v354_v15, %v353_v14  ;;  %v343_v34 = vld [vmem:[%s4238_s4 + $0x8] sm:$0xff]  ;;  %v345_v36 = vld [vmem:[%s4238_s4 + $0x18] sm:$0xff]  ;;  %v346_v37 = vld [vmem:[%s4238_s4 + $0x20] sm:$0xff] }
  0x66   : > { %2861 = vmatpush3.bf16.msra.mxu0 %v368_v4  ;;  %386 = vperm.xlu1 %3289, %v329_v20   ;;  %v347_v38 = vld [vmem:[%s4238_s4 + $0x28] sm:$0xff]  ;;  %v348_v39 = vld [vmem:[%s4238_s4 + $0x30] sm:$0xff]  ;;  %v349_v40 = vld [vmem:[%s4238_s4 + $0x38] sm:$0xff] }
  0x67   : > { %2862 = vmatprep.subr.bf16.mxu0 %v367_v6  ;;  %381 = vperm.xlu0 %3288, %v328_v25   ;;  %v3802_v13 = vld [vmem:[%s3711_s18] sm:$0xff]  ;;  %v3805_v14 = vld [vmem:[%s3711_s18 + $0x8] sm:$0xff]  ;;  %s2666_s18 = sshll.u32 %s3708_s1, 6 }
  0x68   : > { %v3812_v16 = vpack.c.bf16 %v3805_v14, %v3802_v13  ;;  %s4168_s17 = scalar_lea.vmem [#allocation8], %s2666_s18 }
  0x69   : > { %s2550_s14 = sshll.u32 %s4168_s17, 4  ;;  %s4182_s14 = int_to_ptr.vmem [resolvable:$true] %s2550_s14 }
  0x6a   : > { %2863 = vmatpush3.bf16.msra.mxu0 %v367_v6  ;;  %376 = vperm.xlu1 %3289, %v327_v27   ;;  %v503_v17 = vsel %vm409_vm0, %v3812_v16, 0  ;;  %s3436_s7 = scalar_lea.vmem %s4182_s14, 1024  ;;  %p3443_p1 = scmp.lt.s32.totalorder %s4182_s14, %s3441_s12 }
  0x6b   : > { %2864 = vmatprep.subr.bf16.mxu0 %v366_v12  ;;  %371 = vperm.xlu0 %3288, %v326_v29   ;;  %p3437_p11 = scmp.ne.s32.totalorder %s4182_s14, %s3436_s7  ;;  %p3444_p5 = scmp.lt.s32.totalorder %s3442_s15, %s3436_s7 }
  0x6d   : > { %p3438_p9 = pnand %p3437_p11, %p4263_p12  ;;  %p3445_p0 = por %p3444_p5, %p3443_p1 }
  0x6e   : > { %2865 = vmatpush3.bf16.msra.mxu0 %v366_v12  ;;  %2397 = vperm.xlu1 %3289, %v342_v30  }
  0x6f   : > { %2866 = vmatprep.subr.bf16.mxu0 %v365_v18  ;;  %p3439_p10 = pneg %p3438_p9 }
  0x71   : > { %p3446_p2 = pnand %p3445_p0, %p3439_p10 }
  0x72   : > { %2867 = vmatpush3.bf16.msra.mxu0 %v365_v18  ;;  %2402 = vperm.xlu1 %3289, %v343_v34  }
  0x73   : > { %2912 = vmatprep.subr.bf16.mxu0 %v3516_v41 }
  0x75   : > { %2869 = vmatmul.mubr.msk.bf16.vlgmr.msra.gmra.mxu0 %vm409_vm0, %v362_v26 }
  0x76   : > { %2872 = vmatprep.mubr.msk.bf16.mxu0 %vm409_vm0, %v363_v28  ;;  %2407 = vperm.xlu1 %3289, %v344_v35  }
  0x7a   : > { %2412 = vperm.xlu1 %3289, %v345_v36  }
  0x7d   : > { %2873 = vmatmul.mubr.msk.bf16.gmra.mxu0 %vm409_vm0, %v364_v33 }
  0x7e   : > { %2417 = vperm.xlu1 %3289, %v346_v37   ;;  %2914 = vmatprep.mubr.msk.bf16.mxu0 %vm3517_vm1, %v3516_v41 }
  0x82   : > { %2422 = vperm.xlu1 %3289, %v347_v38  }
  0x86   : > { %2427 = vperm.xlu1 %3289, %v348_v39  }
  0x8a   : > { %2432 = vperm.xlu1 %3289, %v349_v40  }
  0xd9   : > { %v392_v43 = vpop.permute.xlu1 %391  ;;  %v402_v44 = vpop.permute.xlu0 %401 }
  0xdd   : > { %v397_v48 = vpop.permute.xlu1 %396  ;;  %v407_v49 = vpop.permute.xlu0 %406 }
  0xe1   : > { %v387_v54 = vpop.permute.xlu1 %386 }
  0xe2   : > { %v382_v56 = vpop.permute.xlu0 %381 }
  0xe5   : > { %v377_v3 = vpop.permute.xlu1 %376 }
  0xe6   : > { %v372_v4 = vpop.permute.xlu0 %371 }
 0x135   : > { %v2870_v42 = vpop.f32.mrf.mxu0 }
 0x136   : > { %v465_v1 = vadd.f32 %v2870_v42, %v382_v56 }
 0x137   : > { %v456_v45 = vpop.f32.mrf.mxu0 }
 0x138   : > { %v489_v8 = vmax.f32 %v465_v1, 0.0  ;;  %v457_v9 = vadd.f32 %v456_v45, %v372_v4 }
 0x139   : > { %v2871_v46 = vpop.f32.mrf.mxu0 }
 0x13a   : > { %v468_v62 = vadd.f32 %v2871_v46, %v387_v54  ;;  %v487_v12 = vmax.f32 %v457_v9, 0.0 }
 0x13b   : > { %v459_v47 = vpop.f32.mrf.mxu0 }
 0x13c   : > { %v490_v5 = vmax.f32 %v468_v62, 0.0  ;;  %v460_v6 = vadd.f32 %v459_v47, %v377_v3  ;;  %v350_v47 = vlaneseq }
 0x13d   : > { %v2874_v50 = vpop.f32.mrf.mxu0 }
 0x13e   : > { %v481_v52 = vadd.f32 %v2874_v50, %v402_v44  ;;  %v3798_v10 = vpack.c.bf16 %v490_v5, %v489_v8  ;;  %v488_v11 = vmax.f32 %v460_v6, 0.0 }
 0x13f   : > { %v472_v51 = vpop.f32.mrf.mxu0 }
 0x140   : > { %v493_v58 = vmax.f32 %v481_v52, 0.0  ;;  %v473_v59 = vadd.f32 %v472_v51, %v392_v43  ;;  %v3808_v15 = vpack.c.bf16 %v488_v11, %v487_v12 }
 0x141   : > { %v2875_v53 = vpop.f32.mrf.mxu0 }
 0x142   : > { %v484_v55 = vadd.f32 %v2875_v53, %v407_v49  ;;  %v491_v2 = vmax.f32 %v473_v59, 0.0 }
 0x143   : > { %v475_v57 = vpop.f32.mrf.mxu0 }
 0x144   : > { %v494_v60 = vmax.f32 %v484_v55, 0.0  ;;  %v476_v61 = vadd.f32 %v475_v57, %v397_v48  ;;  %v351_v48 = vand.u32 127, %v350_v47 }
 0x146   : > { %v3790_v63 = vpack.c.bf16 %v494_v60, %v493_v58  ;;  %v492_v0 = vmax.f32 %v476_v61, 0.0  ;;  %vm352_vm2 = vcmp.lt.s32.totalorder %v351_v48, 64 }
 0x147   : > { %vm3833_vm3 = vmpackc.low %vm352_vm2, %vm352_vm2 }
 0x148   : > { %2877 = vmatpush3.bf16.msra.mxu1 %v3790_v63  ;;  %v3794_v7 = vpack.c.bf16 %v492_v0, %v491_v2 }
 0x149   : > { %2878 = vmatprep.subr.bf16.mxu1 %v3516_v41 }
 0x14c   : > { %2879 = vmatpush3.bf16.msra.mxu1 %v3794_v7 }
 0x14d   : > { %2880 = vmatprep.subr.bf16.mxu1 %v3516_v41 }
 0x150   : > { %2881 = vmatpush3.bf16.msra.mxu1 %v3798_v10 }
 0x151   : > { %2882 = vmatprep.subr.bf16.mxu1 %v3516_v41 }
 0x154   : > { %2883 = vmatpush3.bf16.msra.mxu1 %v3808_v15 }
 0x155   : > { %2888 = vmatprep.subr.bf16.mxu1 %v3516_v41 }
 0x157   : > { %2885 = vmatmul.mubr.msk.bf16.vlgmr.msra.gmra.mxu1 %vm409_vm0, %v3812_v16 }
 0x158   : > { %2889 = vmatpush3.bf16.xpose.msra.mxu1 %v503_v17  ;;  %2890 = vmatprep.mubr.msk.bf16.mxu1 %vm3517_vm1, %v3516_v41 }
 0x159   : > { %2894 = vmatprep.subr.bf16.mxu1 %v3516_v41 }
 0x15f   : > { %2891 = vmatmul.mubr.msk.bf16.vlgmr.msra.gmra.mxu1 %vm409_vm0, %v3812_v16 }
 0x160   : > { %2896 = vmatprep.mubr.msk.bf16.mxu1 %vm3517_vm1, %v3516_v41 }
 0x217   : > { %v3827_v18 = vpop.f32.mrf.mxu1 }
 0x219   : > { %v2886_v19 = vpop.f32.mrf.mxu1 }
 0x21b   : > { %v542_v20 = vpop.f32.mrf.mxu1 }
 0x21c   : > { %v546_v21 = vmax.f32 %v3827_v18, %v542_v20 }
 0x21d   : > { %v2887_v22 = vpop.f32.mrf.mxu1 }
 0x21e   : > { %v547_v23 = vrot.slane %v546_v21, 4 }
 0x21f   : > { %v605_v24 = vpop.f32.mrf.mxu1 }
 0x220   : > { %v548_v25 = vmax.f32 %v546_v21, %v547_v23 }
 0x221   : > { %v2892_v26 = vpop.f32.mrf.mxu1 }
 0x222   : > { %v549_v27 = vrot.slane %v548_v25, 2 }
 0x223   : > { %v608_v28 = vpop.f32.mrf.mxu1 }
 0x224   : > { %v550_v29 = vmax.f32 %v548_v25, %v549_v27  ;;  %v612_v56 = vpack.c.bf16 %v608_v28, %v605_v24 }
 0x225   : > { %v2893_v30 = vpop.f32.mrf.mxu1 }
 0x226   : > { %v551_v31 = vrot.slane %v550_v29, 1 }
 0x228   : > { %v552_v32 = vmax.f32 %v550_v29, %v551_v31 }
 0x22a   : > { %v553_v33 = vsub.f32 %v3827_v18, %v552_v32  ;;  %v554_v34 = vsub.f32 %v542_v20, %v552_v32 }
 0x22c   : > { %v555_v35 = vmul.f32 1.442695, %v553_v33  ;;  %v557_v36 = vmul.f32 1.442695, %v554_v34 }
 0x22e   : > { %3290 = vpow2.f32 %v555_v35 }
 0x22f   : > { %3292 = vpow2.f32 %v557_v36 }
 0x23b   : > { %v3291_v37 = vpop.eup %3290 }
 0x23c   : > { %v3293_v38 = vpop.eup %3292 }
 0x23d   : > { %v559_v39 = vadd.f32 %v3293_v38, %v3291_v37 }
 0x23f   : > { %v560_v40 = vrot.slane %v559_v39, 4 }
 0x241   : > { %v561_v42 = vadd.f32 %v560_v40, %v559_v39 }
 0x243   : > { %v562_v43 = vrot.slane %v561_v42, 2 }
 0x245   : > { %v563_v44 = vadd.f32 %v562_v43, %v561_v42 }
 0x247   : > { %v564_v45 = vrot.slane %v563_v44, 1 }
 0x249   : > { %v565_v46 = vadd.f32 %v564_v45, %v563_v44 }
 0x24b   : > { %3294 = vrcp.f32 %v565_v46 }
 0x258   : > { %v3295_v49 = vpop.eup %3294 }
 0x259   : > { %v567_v50 = vmul.f32 %v3295_v49, %v3291_v37  ;;  %v568_v51 = vmul.f32 %v3295_v49, %v3293_v38 }
 0x25b   : > { %v570_v53 = vsel %vm352_vm2, %v568_v51, 0.0  ;;  %v2676_v54 = vpack.c.bf16 %v568_v51, %v567_v50  ;;  %v569_v0 = vsel %vm352_vm2, %v567_v50, 0.0 }
 0x25c   : > { %v615_v55 = vmul.f32 %v570_v53, %v542_v20  ;;  %v614_v2 = vmul.f32 %v569_v0, %v3827_v18 }
 0x25d   : > { %2895 = vmatpush3.bf16.msk.msra.mxu1 %vm3833_vm3, %v2676_v54 }
 0x25e   : > { %2900 = vmatprep.subr.bf16.mxu1 %v3516_v41 }
 0x260   : > { %2897 = vmatmul.mubr.msk.bf16.vlgmr.msra.gmra.mxu1 %vm616_vm4, %v612_v56 }
 0x261   : > { %2901 = vmatpush3.bf16.xpose.msra.mxu1 %v3790_v63  ;;  %2908 = vmatprep.mubr.msk.bf16.mxu1 %vm3517_vm1, %v3516_v41 }
 0x262   : > { %2902 = vmatprep.subr.bf16.mxu1 %v3516_v41 }
 0x269   : > { %2903 = vmatpush3.bf16.xpose.msra.mxu1 %v3794_v7 }
 0x26a   : > { %2904 = vmatprep.subr.bf16.mxu1 %v3516_v41 }
 0x271   : > { %2905 = vmatpush3.bf16.xpose.msra.mxu1 %v3798_v10 }
 0x272   : > { %2906 = vmatprep.subr.bf16.mxu1 %v3516_v41 }
 0x279   : > { %2907 = vmatpush3.bf16.xpose.msra.mxu1 %v3808_v15 }
 0x27a   : > { %2936 = vmatprep.subr.bf16.mxu1 %v3516_v41 }
 0x320   : > { %v654_v57 = vpop.f32.mrf.mxu1 }
 0x321   : > { %v655_v58 = vadd.f32 1e-06, %v654_v57 }
 0x322   : > { %v2898_v59 = vpop.f32.mrf.mxu1 }
 0x323   : > { %3296 = vrcp.f32 %v655_v58 }
 0x324   : > { %v657_v60 = vpop.f32.mrf.mxu1 }
 0x325   : > { %v658_v61 = vadd.f32 1e-06, %v657_v60 }
 0x326   : > { %v2899_v62 = vpop.f32.mrf.mxu1 }
 0x327   : > { %3298 = vrcp.f32 %v658_v61 }
 0x330   : > { %v3297_v1 = vpop.eup %3296 }
 0x331   : > { %v3854_v4 = vmul.f32 %v3297_v1, %v614_v2 }
 0x334   : > { %v3299_v3 = vpop.eup %3298 }
 0x335   : > { %v3856_v5 = vmul.f32 %v3299_v3, %v615_v55 }
 0x337   : > { %v665_v6 = vpack.c.bf16 %v3856_v5, %v3854_v4 }
 0x339   : > { %2909 = vmatmul.mubr.bf16.vlgmr.msra.gmra.mxu1 %v665_v6  ;;  %2913 = vmatpush3.bf16.xpose.msra.mxu0 %v665_v6 }
 0x33a   : > { %2918 = vmatprep.subr.bf16.mxu0 %v3516_v41  ;;  %2938 = vmatprep.mubr.msk.bf16.mxu1 %vm3517_vm1, %v3516_v41 }
 0x340   : > { %2915 = vmatmul.mubr.bf16.vlgmr.msra.gmra.mxu0 %v665_v6 }
 0x341   : > { %2919 = vmatpush3.bf16.msra.mxu0 %v3812_v16  ;;  %2920 = vmatprep.mubr.msk.bf16.mxu0 %vm3517_vm1, %v3516_v41 }
 0x342   : > { %2924 = vmatprep.subr.bf16.mxu0 %v3516_v41 }
 0x3f9   : > { %v700_v8 = vpop.f32.mrf.mxu1 }
 0x3fa   : > { %v749_v28 = vmul.f32 %v700_v8, %v3802_v13 }
 0x3fb   : > { %v2910_v9 = vpop.f32.mrf.mxu1 }
 0x3fd   : > { %v703_v11 = vpop.f32.mrf.mxu1 }
 0x3fe   : > { %v750_v29 = vmul.f32 %v703_v11, %v3805_v14 }
 0x3ff   : > { %v2911_v12 = vpop.f32.mrf.mxu1 }
 0x400   : > { %v741_v17 = vpop.f32.mrf.mxu0 }
 0x402   : > { %v2916_v18 = vpop.f32.mrf.mxu0 }
 0x404   : > { %v744_v19 = vpop.f32.mrf.mxu0 }
 0x405   : > { %v748_v20 = vpack.c.bf16 %v744_v19, %v741_v17 }
 0x406   : > { %v2917_v21 = vpop.f32.mrf.mxu0 }
 0x407   : > { %2921 = vmatmul.mubr.msk.bf16.vlgmr.msra.gmra.mxu0 %vm616_vm4, %v748_v20 }
 0x408   : > { %2925 = vmatpush3.bf16.msra.mxu0 %v3790_v63  ;;  %2932 = vmatprep.mubr.msk.bf16.mxu0 %vm3517_vm1, %v3516_v41 }
 0x409   : > { %2926 = vmatprep.subr.bf16.mxu0 %v3516_v41 }
 0x40c   : > { %2927 = vmatpush3.bf16.msra.mxu0 %v3794_v7 }
 0x40d   : > { %2928 = vmatprep.subr.bf16.mxu0 %v3516_v41 }
 0x410   : > { %2929 = vmatpush3.bf16.msra.mxu0 %v3798_v10 }
 0x411   : > { %2930 = vmatprep.subr.bf16.mxu0 %v3516_v41 }
 0x414   : > { %2931 = vmatpush3.bf16.msra.mxu0 %v3808_v15 }
 0x415   : > { %2942 = vmatprep.subr.bf16.mxu0 %v3516_v41 }
 0x4c7   : > { %v788_v16 = vpop.f32.mrf.mxu0 }
 0x4c8   : > { %v789_v22 = vadd.f32 1e-06, %v788_v16 }
 0x4c9   : > { %v2922_v23 = vpop.f32.mrf.mxu0 }
 0x4ca   : > { %3300 = vrcp.f32 %v789_v22 }
 0x4cb   : > { %v791_v24 = vpop.f32.mrf.mxu0 }
 0x4cc   : > { %v792_v25 = vadd.f32 1e-06, %v791_v24 }
 0x4cd   : > { %v2923_v26 = vpop.f32.mrf.mxu0 }
 0x4ce   : > { %3302 = vrcp.f32 %v792_v25 }
 0x4d7   : > { %v3301_v27 = vpop.eup %3300 }
 0x4d8   : > { %v3880_v31 = vmul.f32 %v3301_v27, %v749_v28 }
 0x4db   : > { %v3303_v30 = vpop.eup %3302 }
 0x4dc   : > { %v3882_v32 = vmul.f32 %v3303_v30, %v750_v29 }
 0x4de   : > { %v799_v33 = vpack.c.bf16 %v3882_v32, %v3880_v31 }
 0x4e0   : > { %2933 = vmatmul.mubr.msk.bf16.vlgmr.msra.gmra.mxu0 %vm409_vm0, %v799_v33  ;;  %v801_v34 = vsel %vm409_vm0, %v799_v33, 0 }
 0x4e1   : > { %2943 = vmatpush3.bf16.msra.mxu0 %v665_v6  ;;  %2937 = vmatpush3.bf16.xpose.msra.mxu1 %v801_v34 }
 0x4e2   : > { %2948 = vmatprep.subr.bf16.mxu1 %v3516_v41  ;;  %2944 = vmatprep.mubr.msk.bf16.mxu0 %vm3517_vm1, %v3516_v41 }
 0x4e3   : > { %2960 = vmatprep.subr.bf16.mxu0 %v3516_v41 }
 0x4e8   : > { %2939 = vmatmul.mubr.msk.bf16.vlgmr.msra.gmra.mxu1 %vm409_vm0, %v799_v33 }
 0x4e9   : > { %2949 = vmatpush3.bf16.xpose.msra.mxu1 %v3790_v63  ;;  %2956 = vmatprep.mubr.msk.bf16.mxu1 %vm3517_vm1, %v3516_v41 }
 0x4ea   : > { %2950 = vmatprep.subr.bf16.mxu1 %v3516_v41 }
 0x4f1   : > { %2951 = vmatpush3.bf16.xpose.msra.mxu1 %v3794_v7 }
 0x4f2   : > { %2952 = vmatprep.subr.bf16.mxu1 %v3516_v41 }
 0x4f9   : > { %2953 = vmatpush3.bf16.xpose.msra.mxu1 %v3798_v10 }
 0x4fa   : > { %2954 = vmatprep.subr.bf16.mxu1 %v3516_v41 }
 0x501   : > { %2955 = vmatpush3.bf16.xpose.msra.mxu1 %v3808_v15 }
 0x502   : > { %2984 = vmatprep.subr.bf16.mxu1 %v3516_v41 }
 0x5a0   : > { %v837_v13 = vpop.f32.mrf.mxu0 }
 0x5a1   : > { %v886_v50 = vmul.f32 %v837_v13, %v3854_v4 }
 0x5a2   : > { %v2934_v14 = vpop.f32.mrf.mxu0 }
 0x5a4   : > { %v840_v35 = vpop.f32.mrf.mxu0 }
 0x5a5   : > { %v887_v51 = vmul.f32 %v840_v35, %v3856_v5 }
 0x5a6   : > { %v2935_v36 = vpop.f32.mrf.mxu0 }
 0x5a8   : > { %v878_v37 = vpop.f32.mrf.mxu1 }
 0x5aa   : > { %v2940_v38 = vpop.f32.mrf.mxu1 }
 0x5ac   : > { %v881_v39 = vpop.f32.mrf.mxu1 }
 0x5ad   : > { %v885_v40 = vpack.c.bf16 %v881_v39, %v878_v37 }
 0x5ae   : > { %v2941_v42 = vpop.f32.mrf.mxu1 }
 0x5af   : > { %2945 = vmatmul.mubr.msk.bf16.vlgmr.msra.gmra.mxu0 %vm616_vm4, %v885_v40 }
 0x5b0   : > { %2962 = vmatprep.mubr.msk.bf16.mxu0 %vm3517_vm1, %v3516_v41 }
 0x66f   : > { %v925_v43 = vpop.f32.mrf.mxu0 }
 0x670   : > { %v926_v44 = vadd.f32 1e-06, %v925_v43 }
 0x671   : > { %v2946_v45 = vpop.f32.mrf.mxu0 }
 0x672   : > { %3304 = vrcp.f32 %v926_v44 }
 0x673   : > { %v928_v46 = vpop.f32.mrf.mxu0 }
 0x674   : > { %v929_v47 = vadd.f32 1e-06, %v928_v46 }
 0x675   : > { %v2947_v48 = vpop.f32.mrf.mxu0 }
 0x676   : > { %3306 = vrcp.f32 %v929_v47 }
 0x67f   : > { %v3305_v49 = vpop.eup %3304 }
 0x680   : > { %v3908_v54 = vmul.f32 %v3305_v49, %v886_v50 }
 0x683   : > { %v3307_v53 = vpop.eup %3306 }
 0x684   : > { %v3910_v55 = vmul.f32 %v3307_v53, %v887_v51 }
 0x686   : > { %v936_v56 = vpack.c.bf16 %v3910_v55, %v3908_v54 }
 0x688   : > { %2957 = vmatmul.mubr.bf16.vlgmr.msra.gmra.mxu1 %v936_v56  ;;  %2961 = vmatpush3.bf16.xpose.msra.mxu0 %v936_v56 }
 0x689   : > { %2966 = vmatprep.subr.bf16.mxu0 %v3516_v41  ;;  %2986 = vmatprep.mubr.msk.bf16.mxu1 %vm3517_vm1, %v3516_v41 }
 0x68f   : > { %2963 = vmatmul.mubr.bf16.vlgmr.msra.gmra.mxu0 %v936_v56 }
 0x690   : > { %2967 = vmatpush3.bf16.msra.mxu0 %v799_v33  ;;  %2968 = vmatprep.mubr.msk.bf16.mxu0 %vm3517_vm1, %v3516_v41 }
 0x691   : > { %2972 = vmatprep.subr.bf16.mxu0 %v3516_v41 }
 0x748   : > { %v971_v57 = vpop.f32.mrf.mxu1 }
 0x749   : > { %v1020_v12 = vmul.f32 %v971_v57, %v3880_v31 }
 0x74a   : > { %v2958_v58 = vpop.f32.mrf.mxu1 }
 0x74c   : > { %v974_v59 = vpop.f32.mrf.mxu1 }
 0x74d   : > { %v1021_v17 = vmul.f32 %v974_v59, %v3882_v32 }
 0x74e   : > { %v2959_v60 = vpop.f32.mrf.mxu1 }
 0x74f   : > { %v1012_v61 = vpop.f32.mrf.mxu0 }
 0x751   : > { %v2964_v62 = vpop.f32.mrf.mxu0 }
 0x753   : > { %v1015_v0 = vpop.f32.mrf.mxu0 }
 0x754   : > { %v1019_v1 = vpack.c.bf16 %v1015_v0, %v1012_v61 }
 0x755   : > { %v2965_v2 = vpop.f32.mrf.mxu0 }
 0x756   : > { %2969 = vmatmul.mubr.msk.bf16.vlgmr.msra.gmra.mxu0 %vm616_vm4, %v1019_v1 }
 0x757   : > { %2973 = vmatpush3.bf16.msra.mxu0 %v3790_v63  ;;  %2980 = vmatprep.mubr.msk.bf16.mxu0 %vm3517_vm1, %v3516_v41 }
 0x758   : > { %2974 = vmatprep.subr.bf16.mxu0 %v3516_v41 }
 0x75b   : > { %2975 = vmatpush3.bf16.msra.mxu0 %v3794_v7 }
 0x75c   : > { %2976 = vmatprep.subr.bf16.mxu0 %v3516_v41 }
 0x75f   : > { %2977 = vmatpush3.bf16.msra.mxu0 %v3798_v10 }
 0x760   : > { %2978 = vmatprep.subr.bf16.mxu0 %v3516_v41 }
 0x763   : > { %2979 = vmatpush3.bf16.msra.mxu0 %v3808_v15 }
 0x764   : > { %2990 = vmatprep.subr.bf16.mxu0 %v3516_v41 }
 0x816   : > { %v1059_v3 = vpop.f32.mrf.mxu0 }
 0x817   : > { %v1060_v4 = vadd.f32 1e-06, %v1059_v3 }
 0x818   : > { %v2970_v5 = vpop.f32.mrf.mxu0 }
 0x819   : > { %3308 = vrcp.f32 %v1060_v4 }
 0x81a   : > { %v1062_v6 = vpop.f32.mrf.mxu0 }
 0x81b   : > { %v1063_v8 = vadd.f32 1e-06, %v1062_v6 }
 0x81c   : > { %v2971_v9 = vpop.f32.mrf.mxu0 }
 0x81d   : > { %3310 = vrcp.f32 %v1063_v8 }
 0x826   : > { %v3309_v11 = vpop.eup %3308 }
 0x827   : > { %v3933_v19 = vmul.f32 %v3309_v11, %v1020_v12 }
 0x82a   : > { %v3311_v18 = vpop.eup %3310 }
 0x82b   : > { %v3935_v20 = vmul.f32 %v3311_v18, %v1021_v17 }
 0x82d   : > { %v1070_v21 = vpack.c.bf16 %v3935_v20, %v3933_v19 }
 0x82f   : > { %2981 = vmatmul.mubr.msk.bf16.vlgmr.msra.gmra.mxu0 %vm409_vm0, %v1070_v21  ;;  %v1072_v16 = vsel %vm409_vm0, %v1070_v21, 0 }
 0x830   : > { %2991 = vmatpush3.bf16.msra.mxu0 %v936_v56  ;;  %2985 = vmatpush3.bf16.xpose.msra.mxu1 %v1072_v16 }
 0x831   : > { %2996 = vmatprep.subr.bf16.mxu1 %v3516_v41  ;;  %2992 = vmatprep.mubr.msk.bf16.mxu0 %vm3517_vm1, %v3516_v41 }
 0x832   : > { %3008 = vmatprep.subr.bf16.mxu0 %v3516_v41 }
 0x837   : > { %2987 = vmatmul.mubr.msk.bf16.vlgmr.msra.gmra.mxu1 %vm409_vm0, %v1070_v21 }
 0x838   : > { %2997 = vmatpush3.bf16.xpose.msra.mxu1 %v3790_v63  ;;  %3004 = vmatprep.mubr.msk.bf16.mxu1 %vm3517_vm1, %v3516_v41 }
 0x839   : > { %2998 = vmatprep.subr.bf16.mxu1 %v3516_v41 }
 0x840   : > { %2999 = vmatpush3.bf16.xpose.msra.mxu1 %v3794_v7 }
 0x841   : > { %3000 = vmatprep.subr.bf16.mxu1 %v3516_v41 }
 0x848   : > { %3001 = vmatpush3.bf16.xpose.msra.mxu1 %v3798_v10 }
 0x849   : > { %3002 = vmatprep.subr.bf16.mxu1 %v3516_v41 }
 0x850   : > { %3003 = vmatpush3.bf16.xpose.msra.mxu1 %v3808_v15 }
 0x851   : > { %3032 = vmatprep.subr.bf16.mxu1 %v3516_v41 }
 0x8ef   : > { %v1108_v22 = vpop.f32.mrf.mxu0 }
 0x8f0   : > { %v1157_v36 = vmul.f32 %v1108_v22, %v3908_v54 }
 0x8f1   : > { %v2982_v23 = vpop.f32.mrf.mxu0 }
 0x8f3   : > { %v1111_v24 = vpop.f32.mrf.mxu0 }
 0x8f4   : > { %v1158_v37 = vmul.f32 %v1111_v24, %v3910_v55 }
 0x8f5   : > { %v2983_v25 = vpop.f32.mrf.mxu0 }
 0x8f7   : > { %v1149_v26 = vpop.f32.mrf.mxu1 }
 0x8f9   : > { %v2988_v27 = vpop.f32.mrf.mxu1 }
 0x8fb   : > { %v1152_v28 = vpop.f32.mrf.mxu1 }
 0x8fc   : > { %v1156_v29 = vpack.c.bf16 %v1152_v28, %v1149_v26 }
 0x8fd   : > { %v2989_v30 = vpop.f32.mrf.mxu1 }
 0x8fe   : > { %2993 = vmatmul.mubr.msk.bf16.vlgmr.msra.gmra.mxu0 %vm616_vm4, %v1156_v29 }
 0x8ff   : > { %3010 = vmatprep.mubr.msk.bf16.mxu0 %vm3517_vm1, %v3516_v41 }
 0x9be   : > { %v1196_v31 = vpop.f32.mrf.mxu0 }
 0x9bf   : > { %v1197_v32 = vadd.f32 1e-06, %v1196_v31 }
 0x9c0   : > { %v2994_v33 = vpop.f32.mrf.mxu0 }
 0x9c1   : > { %3312 = vrcp.f32 %v1197_v32 }
 0x9c2   : > { %v1199_v34 = vpop.f32.mrf.mxu0 }
 0x9c3   : > { %v1200_v13 = vadd.f32 1e-06, %v1199_v34 }
 0x9c4   : > { %v2995_v14 = vpop.f32.mrf.mxu0 }
 0x9c5   : > { %3314 = vrcp.f32 %v1200_v13 }
 0x9ce   : > { %v3313_v35 = vpop.eup %3312 }
 0x9cf   : > { %v3961_v39 = vmul.f32 %v3313_v35, %v1157_v36 }
 0x9d2   : > { %v3315_v38 = vpop.eup %3314 }
 0x9d3   : > { %v3963_v40 = vmul.f32 %v3315_v38, %v1158_v37 }
 0x9d5   : > { %v1207_v42 = vpack.c.bf16 %v3963_v40, %v3961_v39 }
 0x9d7   : > { %3005 = vmatmul.mubr.bf16.vlgmr.msra.gmra.mxu1 %v1207_v42  ;;  %3009 = vmatpush3.bf16.xpose.msra.mxu0 %v1207_v42 }
 0x9d8   : > { %3014 = vmatprep.subr.bf16.mxu0 %v3516_v41  ;;  %3034 = vmatprep.mubr.msk.bf16.mxu1 %vm3517_vm1, %v3516_v41 }
 0x9de   : > { %3011 = vmatmul.mubr.bf16.vlgmr.msra.gmra.mxu0 %v1207_v42 }
 0x9df   : > { %3015 = vmatpush3.bf16.msra.mxu0 %v1070_v21  ;;  %3016 = vmatprep.mubr.msk.bf16.mxu0 %vm3517_vm1, %v3516_v41 }
 0x9e0   : > { %3020 = vmatprep.subr.bf16.mxu0 %v3516_v41 }
 0xa97   : > { %v1242_v43 = vpop.f32.mrf.mxu1 }
 0xa98   : > { %v1291_v60 = vmul.f32 %v1242_v43, %v3933_v19 }
 0xa99   : > { %v3006_v44 = vpop.f32.mrf.mxu1 }
 0xa9b   : > { %v1245_v45 = vpop.f32.mrf.mxu1 }
 0xa9c   : > { %v1292_v61 = vmul.f32 %v1245_v45, %v3935_v20 }
 0xa9d   : > { %v3007_v46 = vpop.f32.mrf.mxu1 }
 0xa9e   : > { %v1283_v47 = vpop.f32.mrf.mxu0 }
 0xaa0   : > { %v3012_v48 = vpop.f32.mrf.mxu0 }
 0xaa2   : > { %v1286_v49 = vpop.f32.mrf.mxu0 }
 0xaa3   : > { %v1290_v50 = vpack.c.bf16 %v1286_v49, %v1283_v47 }
 0xaa4   : > { %v3013_v51 = vpop.f32.mrf.mxu0 }
 0xaa5   : > { %3017 = vmatmul.mubr.msk.bf16.vlgmr.msra.gmra.mxu0 %vm616_vm4, %v1290_v50 }
 0xaa6   : > { %3021 = vmatpush3.bf16.msra.mxu0 %v3790_v63  ;;  %3028 = vmatprep.mubr.msk.bf16.mxu0 %vm3517_vm1, %v3516_v41 }
 0xaa7   : > { %3022 = vmatprep.subr.bf16.mxu0 %v3516_v41 }
 0xaaa   : > { %3023 = vmatpush3.bf16.msra.mxu0 %v3794_v7 }
 0xaab   : > { %3024 = vmatprep.subr.bf16.mxu0 %v3516_v41 }
 0xaae   : > { %3025 = vmatpush3.bf16.msra.mxu0 %v3798_v10 }
 0xaaf   : > { %3026 = vmatprep.subr.bf16.mxu0 %v3516_v41 }
 0xab2   : > { %3027 = vmatpush3.bf16.msra.mxu0 %v3808_v15 }
 0xab3   : > { %3038 = vmatprep.subr.bf16.mxu0 %v3516_v41 }
 0xb65   : > { %v1330_v53 = vpop.f32.mrf.mxu0 }
 0xb66   : > { %v1331_v54 = vadd.f32 1e-06, %v1330_v53 }
 0xb67   : > { %v3018_v55 = vpop.f32.mrf.mxu0 }
 0xb68   : > { %3316 = vrcp.f32 %v1331_v54 }
 0xb69   : > { %v1333_v56 = vpop.f32.mrf.mxu0 }
 0xb6a   : > { %v1334_v57 = vadd.f32 1e-06, %v1333_v56 }
 0xb6b   : > { %v3019_v58 = vpop.f32.mrf.mxu0 }
 0xb6c   : > { %3318 = vrcp.f32 %v1334_v57 }
 0xb75   : > { %v3317_v59 = vpop.eup %3316 }
 0xb76   : > { %v3986_v0 = vmul.f32 %v3317_v59, %v1291_v60 }
 0xb79   : > { %v3319_v62 = vpop.eup %3318 }
 0xb7a   : > { %v3988_v1 = vmul.f32 %v3319_v62, %v1292_v61 }
 0xb7c   : > { %v1341_v2 = vpack.c.bf16 %v3988_v1, %v3986_v0 }
 0xb7e   : > { %3029 = vmatmul.mubr.msk.bf16.vlgmr.msra.gmra.mxu0 %vm409_vm0, %v1341_v2  ;;  %v1343_v3 = vsel %vm409_vm0, %v1341_v2, 0 }
 0xb7f   : > { %3039 = vmatpush3.bf16.msra.mxu0 %v1207_v42  ;;  %3033 = vmatpush3.bf16.xpose.msra.mxu1 %v1343_v3 }
 0xb80   : > { %3044 = vmatprep.subr.bf16.mxu1 %v3516_v41  ;;  %3040 = vmatprep.mubr.msk.bf16.mxu0 %vm3517_vm1, %v3516_v41 }
 0xb81   : > { %3056 = vmatprep.subr.bf16.mxu0 %v3516_v41 }
 0xb86   : > { %3035 = vmatmul.mubr.msk.bf16.vlgmr.msra.gmra.mxu1 %vm409_vm0, %v1341_v2 }
 0xb87   : > { %3045 = vmatpush3.bf16.xpose.msra.mxu1 %v3790_v63  ;;  %3052 = vmatprep.mubr.msk.bf16.mxu1 %vm3517_vm1, %v3516_v41 }
 0xb88   : > { %3046 = vmatprep.subr.bf16.mxu1 %v3516_v41 }
 0xb8f   : > { %3047 = vmatpush3.bf16.xpose.msra.mxu1 %v3794_v7 }
 0xb90   : > { %3048 = vmatprep.subr.bf16.mxu1 %v3516_v41 }
 0xb97   : > { %3049 = vmatpush3.bf16.xpose.msra.mxu1 %v3798_v10 }
 0xb98   : > { %3050 = vmatprep.subr.bf16.mxu1 %v3516_v41 }
 0xb9f   : > { %3051 = vmatpush3.bf16.xpose.msra.mxu1 %v3808_v15 }
 0xba0   : > { %3080 = vmatprep.subr.bf16.mxu1 %v3516_v41 }
 0xc3e   : > { %v1379_v4 = vpop.f32.mrf.mxu0 }
 0xc3f   : > { %v1428_v25 = vmul.f32 %v1379_v4, %v3961_v39 }
 0xc40   : > { %v3030_v5 = vpop.f32.mrf.mxu0 }
 0xc42   : > { %v1382_v6 = vpop.f32.mrf.mxu0 }
 0xc43   : > { %v1429_v26 = vmul.f32 %v1382_v6, %v3963_v40 }
 0xc44   : > { %v3031_v8 = vpop.f32.mrf.mxu0 }
 0xc46   : > { %v1420_v9 = vpop.f32.mrf.mxu1 }
 0xc48   : > { %v3036_v11 = vpop.f32.mrf.mxu1 }
 0xc4a   : > { %v1423_v12 = vpop.f32.mrf.mxu1 }
 0xc4b   : > { %v1427_v17 = vpack.c.bf16 %v1423_v12, %v1420_v9 }
 0xc4c   : > { %v3037_v18 = vpop.f32.mrf.mxu1 }
 0xc4d   : > { %3041 = vmatmul.mubr.msk.bf16.vlgmr.msra.gmra.mxu0 %vm616_vm4, %v1427_v17 }
 0xc4e   : > { %3058 = vmatprep.mubr.msk.bf16.mxu0 %vm3517_vm1, %v3516_v41 }
 0xd0d   : > { %v1467_v19 = vpop.f32.mrf.mxu0 }
 0xd0e   : > { %v1468_v20 = vadd.f32 1e-06, %v1467_v19 }
 0xd0f   : > { %v3042_v21 = vpop.f32.mrf.mxu0 }
 0xd10   : > { %3320 = vrcp.f32 %v1468_v20 }
 0xd11   : > { %v1470_v16 = vpop.f32.mrf.mxu0 }
 0xd12   : > { %v1471_v22 = vadd.f32 1e-06, %v1470_v16 }
 0xd13   : > { %v3043_v23 = vpop.f32.mrf.mxu0 }
 0xd14   : > { %3322 = vrcp.f32 %v1471_v22 }
 0xd1d   : > { %v3321_v24 = vpop.eup %3320 }
 0xd1e   : > { %v4014_v28 = vmul.f32 %v3321_v24, %v1428_v25 }
 0xd21   : > { %v3323_v27 = vpop.eup %3322 }
 0xd22   : > { %v4016_v29 = vmul.f32 %v3323_v27, %v1429_v26 }
 0xd24   : > { %v1478_v30 = vpack.c.bf16 %v4016_v29, %v4014_v28 }
 0xd26   : > { %3053 = vmatmul.mubr.bf16.vlgmr.msra.gmra.mxu1 %v1478_v30  ;;  %3057 = vmatpush3.bf16.xpose.msra.mxu0 %v1478_v30 }
 0xd27   : > { %3062 = vmatprep.subr.bf16.mxu0 %v3516_v41  ;;  %3082 = vmatprep.mubr.msk.bf16.mxu1 %vm3517_vm1, %v3516_v41 }
 0xd2d   : > { %3059 = vmatmul.mubr.bf16.vlgmr.msra.gmra.mxu0 %v1478_v30 }
 0xd2e   : > { %3063 = vmatpush3.bf16.msra.mxu0 %v1341_v2  ;;  %3064 = vmatprep.mubr.msk.bf16.mxu0 %vm3517_vm1, %v3516_v41 }
 0xd2f   : > { %3068 = vmatprep.subr.bf16.mxu0 %v3516_v41 }
 0xde6   : > { %v1513_v31 = vpop.f32.mrf.mxu1 }
 0xde7   : > { %v1562_v46 = vmul.f32 %v1513_v31, %v3986_v0 }
 0xde8   : > { %v3054_v32 = vpop.f32.mrf.mxu1 }
 0xdea   : > { %v1516_v33 = vpop.f32.mrf.mxu1 }
 0xdeb   : > { %v1563_v47 = vmul.f32 %v1516_v33, %v3988_v1 }
 0xdec   : > { %v3055_v34 = vpop.f32.mrf.mxu1 }
 0xded   : > { %v1554_v13 = vpop.f32.mrf.mxu0 }
 0xdef   : > { %v3060_v14 = vpop.f32.mrf.mxu0 }
 0xdf1   : > { %v1557_v35 = vpop.f32.mrf.mxu0 }
 0xdf2   : > { %v1561_v36 = vpack.c.bf16 %v1557_v35, %v1554_v13 }
 0xdf3   : > { %v3061_v37 = vpop.f32.mrf.mxu0 }
 0xdf4   : > { %3065 = vmatmul.mubr.msk.bf16.vlgmr.msra.gmra.mxu0 %vm616_vm4, %v1561_v36 }
 0xdf5   : > { %3069 = vmatpush3.bf16.msra.mxu0 %v3790_v63  ;;  %3076 = vmatprep.mubr.msk.bf16.mxu0 %vm3517_vm1, %v3516_v41 }
 0xdf6   : > { %3070 = vmatprep.subr.bf16.mxu0 %v3516_v41 }
 0xdf9   : > { %3071 = vmatpush3.bf16.msra.mxu0 %v3794_v7 }
 0xdfa   : > { %3072 = vmatprep.subr.bf16.mxu0 %v3516_v41 }
 0xdfd   : > { %3073 = vmatpush3.bf16.msra.mxu0 %v3798_v10 }
 0xdfe   : > { %3074 = vmatprep.subr.bf16.mxu0 %v3516_v41 }
 0xe01   : > { %3075 = vmatpush3.bf16.msra.mxu0 %v3808_v15 }
 0xe02   : > { %3086 = vmatprep.subr.bf16.mxu0 %v3516_v41 }
 0xeb4   : > { %v1601_v38 = vpop.f32.mrf.mxu0 }
 0xeb5   : > { %v1602_v39 = vadd.f32 1e-06, %v1601_v38 }
 0xeb6   : > { %v3066_v40 = vpop.f32.mrf.mxu0 }
 0xeb7   : > { %3324 = vrcp.f32 %v1602_v39 }
 0xeb8   : > { %v1604_v42 = vpop.f32.mrf.mxu0 }
 0xeb9   : > { %v1605_v43 = vadd.f32 1e-06, %v1604_v42 }
 0xeba   : > { %v3067_v44 = vpop.f32.mrf.mxu0 }
 0xebb   : > { %3326 = vrcp.f32 %v1605_v43 }
 0xec4   : > { %v3325_v45 = vpop.eup %3324 }
 0xec5   : > { %v4039_v49 = vmul.f32 %v3325_v45, %v1562_v46 }
 0xec8   : > { %v3327_v48 = vpop.eup %3326 }
 0xec9   : > { %v4041_v50 = vmul.f32 %v3327_v48, %v1563_v47 }
 0xecb   : > { %v1612_v51 = vpack.c.bf16 %v4041_v50, %v4039_v49 }
 0xecd   : > { %3077 = vmatmul.mubr.msk.bf16.vlgmr.msra.gmra.mxu0 %vm409_vm0, %v1612_v51  ;;  %v1614_v53 = vsel %vm409_vm0, %v1612_v51, 0 }
 0xece   : > { %3087 = vmatpush3.bf16.msra.mxu0 %v1478_v30  ;;  %3081 = vmatpush3.bf16.xpose.msra.mxu1 %v1614_v53 }
 0xecf   : > { %3092 = vmatprep.subr.bf16.mxu1 %v3516_v41  ;;  %3088 = vmatprep.mubr.msk.bf16.mxu0 %vm3517_vm1, %v3516_v41 }
 0xed0   : > { %3104 = vmatprep.subr.bf16.mxu0 %v3516_v41 }
 0xed5   : > { %3083 = vmatmul.mubr.msk.bf16.vlgmr.msra.gmra.mxu1 %vm409_vm0, %v1612_v51 }
 0xed6   : > { %3093 = vmatpush3.bf16.xpose.msra.mxu1 %v3790_v63  ;;  %3100 = vmatprep.mubr.msk.bf16.mxu1 %vm3517_vm1, %v3516_v41 }
 0xed7   : > { %3094 = vmatprep.subr.bf16.mxu1 %v3516_v41 }
 0xede   : > { %3095 = vmatpush3.bf16.xpose.msra.mxu1 %v3794_v7 }
 0xedf   : > { %3096 = vmatprep.subr.bf16.mxu1 %v3516_v41 }
 0xee6   : > { %3097 = vmatpush3.bf16.xpose.msra.mxu1 %v3798_v10 }
 0xee7   : > { %3098 = vmatprep.subr.bf16.mxu1 %v3516_v41 }
 0xeee   : > { %3099 = vmatpush3.bf16.xpose.msra.mxu1 %v3808_v15 }
 0xeef   : > { %3128 = vmatprep.subr.bf16.mxu1 %v3516_v41 }
 0xf8d   : > { %v1650_v54 = vpop.f32.mrf.mxu0 }
 0xf8e   : > { %v1699_v8 = vmul.f32 %v1650_v54, %v4014_v28 }
 0xf8f   : > { %v3078_v55 = vpop.f32.mrf.mxu0 }
 0xf91   : > { %v1653_v56 = vpop.f32.mrf.mxu0 }
 0xf92   : > { %v1700_v9 = vmul.f32 %v1653_v56, %v4016_v29 }
 0xf93   : > { %v3079_v57 = vpop.f32.mrf.mxu0 }
 0xf95   : > { %v1691_v58 = vpop.f32.mrf.mxu1 }
 0xf97   : > { %v3084_v59 = vpop.f32.mrf.mxu1 }
 0xf99   : > { %v1694_v60 = vpop.f32.mrf.mxu1 }
 0xf9a   : > { %v1698_v61 = vpack.c.bf16 %v1694_v60, %v1691_v58 }
 0xf9b   : > { %v3085_v62 = vpop.f32.mrf.mxu1 }
 0xf9c   : > { %3089 = vmatmul.mubr.msk.bf16.vlgmr.msra.gmra.mxu0 %vm616_vm4, %v1698_v61 }
 0xf9d   : > { %3106 = vmatprep.mubr.msk.bf16.mxu0 %vm3517_vm1, %v3516_v41 }
0x105c   : > { %v1738_v0 = vpop.f32.mrf.mxu0 }
0x105d   : > { %v1739_v1 = vadd.f32 1e-06, %v1738_v0 }
0x105e   : > { %v3090_v2 = vpop.f32.mrf.mxu0 }
0x105f   : > { %3328 = vrcp.f32 %v1739_v1 }
0x1060   : > { %v1741_v3 = vpop.f32.mrf.mxu0 }
0x1061   : > { %v1742_v4 = vadd.f32 1e-06, %v1741_v3 }
0x1062   : > { %v3091_v5 = vpop.f32.mrf.mxu0 }
0x1063   : > { %3330 = vrcp.f32 %v1742_v4 }
0x106c   : > { %v3329_v6 = vpop.eup %3328 }
0x106d   : > { %v4067_v12 = vmul.f32 %v3329_v6, %v1699_v8 }
0x1070   : > { %v3331_v11 = vpop.eup %3330 }
0x1071   : > { %v4069_v17 = vmul.f32 %v3331_v11, %v1700_v9 }
0x1073   : > { %v1749_v18 = vpack.c.bf16 %v4069_v17, %v4067_v12 }
0x1075   : > { %3101 = vmatmul.mubr.bf16.vlgmr.msra.gmra.mxu1 %v1749_v18  ;;  %3105 = vmatpush3.bf16.xpose.msra.mxu0 %v1749_v18 }
0x1076   : > { %3110 = vmatprep.subr.bf16.mxu0 %v3516_v41  ;;  %3130 = vmatprep.mubr.msk.bf16.mxu1 %vm3517_vm1, %v3516_v41 }
0x107c   : > { %3107 = vmatmul.mubr.bf16.vlgmr.msra.gmra.mxu0 %v1749_v18 }
0x107d   : > { %3111 = vmatpush3.bf16.msra.mxu0 %v1612_v51  ;;  %3112 = vmatprep.mubr.msk.bf16.mxu0 %vm3517_vm1, %v3516_v41 }
0x107e   : > { %3116 = vmatprep.subr.bf16.mxu0 %v3516_v41 }
0x1135   : > { %v1784_v19 = vpop.f32.mrf.mxu1 }
0x1136   : > { %v1833_v34 = vmul.f32 %v1784_v19, %v4039_v49 }
0x1137   : > { %v3102_v20 = vpop.f32.mrf.mxu1 }
0x1139   : > { %v1787_v21 = vpop.f32.mrf.mxu1 }
0x113a   : > { %v1834_v13 = vmul.f32 %v1787_v21, %v4041_v50 }
0x113b   : > { %v3103_v16 = vpop.f32.mrf.mxu1 }
0x113c   : > { %v1825_v22 = vpop.f32.mrf.mxu0 }
0x113e   : > { %v3108_v23 = vpop.f32.mrf.mxu0 }
0x1140   : > { %v1828_v24 = vpop.f32.mrf.mxu0 }
0x1141   : > { %v1832_v25 = vpack.c.bf16 %v1828_v24, %v1825_v22 }
0x1142   : > { %v3109_v26 = vpop.f32.mrf.mxu0 }
0x1143   : > { %3113 = vmatmul.mubr.msk.bf16.vlgmr.msra.gmra.mxu0 %vm616_vm4, %v1832_v25 }
0x1144   : > { %3117 = vmatpush3.bf16.msra.mxu0 %v3790_v63  ;;  %3124 = vmatprep.mubr.msk.bf16.mxu0 %vm3517_vm1, %v3516_v41 }
0x1145   : > { %3118 = vmatprep.subr.bf16.mxu0 %v3516_v41 }
0x1148   : > { %3119 = vmatpush3.bf16.msra.mxu0 %v3794_v7 }
0x1149   : > { %3120 = vmatprep.subr.bf16.mxu0 %v3516_v41 }
0x114c   : > { %3121 = vmatpush3.bf16.msra.mxu0 %v3798_v10 }
0x114d   : > { %3122 = vmatprep.subr.bf16.mxu0 %v3516_v41 }
0x1150   : > { %3123 = vmatpush3.bf16.msra.mxu0 %v3808_v15 }
0x1151   : > { %3134 = vmatprep.subr.bf16.mxu0 %v3516_v41 }
0x1203   : > { %v1872_v27 = vpop.f32.mrf.mxu0 }
0x1204   : > { %v1873_v28 = vadd.f32 1e-06, %v1872_v27 }
0x1205   : > { %v3114_v29 = vpop.f32.mrf.mxu0 }
0x1206   : > { %3332 = vrcp.f32 %v1873_v28 }
0x1207   : > { %v1875_v30 = vpop.f32.mrf.mxu0 }
0x1208   : > { %v1876_v31 = vadd.f32 1e-06, %v1875_v30 }
0x1209   : > { %v3115_v32 = vpop.f32.mrf.mxu0 }
0x120a   : > { %3334 = vrcp.f32 %v1876_v31 }
0x1213   : > { %v3333_v33 = vpop.eup %3332 }
0x1214   : > { %v4092_v35 = vmul.f32 %v3333_v33, %v1833_v34 }
0x1217   : > { %v3335_v14 = vpop.eup %3334 }
0x1218   : > { %v4094_v36 = vmul.f32 %v3335_v14, %v1834_v13 }
0x121a   : > { %v1883_v37 = vpack.c.bf16 %v4094_v36, %v4092_v35 }
0x121c   : > { %3125 = vmatmul.mubr.msk.bf16.vlgmr.msra.gmra.mxu0 %vm409_vm0, %v1883_v37  ;;  %v1885_v38 = vsel %vm409_vm0, %v1883_v37, 0 }
0x121d   : > { %3135 = vmatpush3.bf16.msra.mxu0 %v1749_v18  ;;  %3129 = vmatpush3.bf16.xpose.msra.mxu1 %v1885_v38 }
0x121e   : > { %3140 = vmatprep.subr.bf16.mxu1 %v3516_v41  ;;  %3136 = vmatprep.mubr.msk.bf16.mxu0 %vm3517_vm1, %v3516_v41 }
0x121f   : > { %3152 = vmatprep.subr.bf16.mxu0 %v3516_v41 }
0x1224   : > { %3131 = vmatmul.mubr.msk.bf16.vlgmr.msra.gmra.mxu1 %vm409_vm0, %v1883_v37 }
0x1225   : > { %3141 = vmatpush3.bf16.xpose.msra.mxu1 %v3790_v63  ;;  %3148 = vmatprep.mubr.msk.bf16.mxu1 %vm3517_vm1, %v3516_v41 }
0x1226   : > { %3142 = vmatprep.subr.bf16.mxu1 %v3516_v41 }
0x122d   : > { %3143 = vmatpush3.bf16.xpose.msra.mxu1 %v3794_v7 }
0x122e   : > { %3144 = vmatprep.subr.bf16.mxu1 %v3516_v41 }
0x1235   : > { %3145 = vmatpush3.bf16.xpose.msra.mxu1 %v3798_v10 }
0x1236   : > { %3146 = vmatprep.subr.bf16.mxu1 %v3516_v41 }
0x123d   : > { %3147 = vmatpush3.bf16.xpose.msra.mxu1 %v3808_v15 }
0x123e   : > { %3176 = vmatprep.subr.bf16.mxu1 %v3516_v41 }
0x12dc   : > { %v1921_v39 = vpop.f32.mrf.mxu0 }
0x12dd   : > { %v1970_v57 = vmul.f32 %v1921_v39, %v4067_v12 }
0x12de   : > { %v3126_v40 = vpop.f32.mrf.mxu0 }
0x12e0   : > { %v1924_v42 = vpop.f32.mrf.mxu0 }
0x12e1   : > { %v1971_v58 = vmul.f32 %v1924_v42, %v4069_v17 }
0x12e2   : > { %v3127_v43 = vpop.f32.mrf.mxu0 }
0x12e4   : > { %v1962_v44 = vpop.f32.mrf.mxu1 }
0x12e6   : > { %v3132_v45 = vpop.f32.mrf.mxu1 }
0x12e8   : > { %v1965_v46 = vpop.f32.mrf.mxu1 }
0x12e9   : > { %v1969_v47 = vpack.c.bf16 %v1965_v46, %v1962_v44 }
0x12ea   : > { %v3133_v48 = vpop.f32.mrf.mxu1 }
0x12eb   : > { %3137 = vmatmul.mubr.msk.bf16.vlgmr.msra.gmra.mxu0 %vm616_vm4, %v1969_v47  ;;  %v334_v48 = vld [vmem:[#allocation5] sm:$0xff] }
0x12ec   : > { %3154 = vmatprep.mubr.msk.bf16.mxu0 %vm3517_vm1, %v3516_v41 }
0x13ab   : > { %v2009_v49 = vpop.f32.mrf.mxu0 }
0x13ac   : > { %v2010_v50 = vadd.f32 1e-06, %v2009_v49  ;;  %v335_v49 = vld [vmem:[#allocation5 + $0x8] sm:$0xff] }
0x13ad   : > { %v3138_v51 = vpop.f32.mrf.mxu0 }
0x13ae   : > { %3336 = vrcp.f32 %v2010_v50  ;;  %v2387_v50 = vpack.c.bf16 %v335_v49, %v334_v48  ;;  %v3354_v49 = vld [vmem:[%s3722_s20 + $0x38] sm:$0xff] }
0x13af   : > { %v2012_v53 = vpop.f32.mrf.mxu0 }
0x13b0   : > { %v2013_v54 = vadd.f32 1e-06, %v2012_v53 }
0x13b1   : > { %v3139_v55 = vpop.f32.mrf.mxu0 }
0x13b2   : > { %3338 = vrcp.f32 %v2013_v54 }
0x13bb   : > { %v3337_v56 = vpop.eup %3336 }
0x13bc   : > { %v4120_v60 = vmul.f32 %v3337_v56, %v1970_v57 }
0x13bf   : > { %v3339_v59 = vpop.eup %3338 }
0x13c0   : > { %v4122_v61 = vmul.f32 %v3339_v59, %v1971_v58 }
0x13c2   : > { %v2020_v62 = vpack.c.bf16 %v4122_v61, %v4120_v60 }
0x13c4   : > { %3149 = vmatmul.mubr.bf16.vlgmr.msra.gmra.mxu1 %v2020_v62  ;;  %3153 = vmatpush3.bf16.xpose.msra.mxu0 %v2020_v62 }
0x13c5   : > { %3158 = vmatprep.subr.bf16.mxu0 %v3516_v41  ;;  %3178 = vmatprep.mubr.msk.bf16.mxu1 %vm3517_vm1, %v3516_v41 }
0x13cb   : > { %3155 = vmatmul.mubr.bf16.vlgmr.msra.gmra.mxu0 %v2020_v62 }
0x13cc   : > { %3159 = vmatpush3.bf16.msra.mxu0 %v1883_v37  ;;  %3160 = vmatprep.mubr.msk.bf16.mxu0 %vm3517_vm1, %v3516_v41 }
0x13cd   : > { %3164 = vmatprep.subr.bf16.mxu0 %v3516_v41 }
0x1484   : > { %v2055_v0 = vpop.f32.mrf.mxu1 }
0x1486   : > { %v3150_v1 = vpop.f32.mrf.mxu1 }
0x1487   : > { %v337_v1 = vld [vmem:[#allocation5 + $0x18] sm:$0xff] }
0x1488   : > { %v2058_v2 = vpop.f32.mrf.mxu1 }
0x1489   : > { %v2105_v21 = vmul.f32 %v2058_v2, %v4094_v36  ;;  %v338_v2 = vld [vmem:[#allocation5 + $0x20] sm:$0xff] }
0x148a   : > { %v3151_v3 = vpop.f32.mrf.mxu1 }
0x148b   : > { %v2096_v4 = vpop.f32.mrf.mxu0  ;;  %v339_v3 = vld [vmem:[#allocation5 + $0x28] sm:$0xff] }
0x148d   : > { %v3156_v5 = vpop.f32.mrf.mxu0 }
0x148e   : > { %v2389_v5 = vpack.c.bf16 %v339_v3, %v338_v2 }
0x148f   : > { %v2099_v6 = vpop.f32.mrf.mxu0 }
0x1490   : > { %v2103_v8 = vpack.c.bf16 %v2099_v6, %v2096_v4  ;;  %v340_v6 = vld [vmem:[#allocation5 + $0x30] sm:$0xff] }
0x1491   : > { %v3157_v9 = vpop.f32.mrf.mxu0 }
0x1492   : > { %3161 = vmatmul.mubr.msk.bf16.vlgmr.msra.gmra.mxu0 %vm616_vm4, %v2103_v8  ;;  %v341_v8 = vld [vmem:[#allocation5 + $0x38] sm:$0xff] }
0x1493   : > { %3165 = vmatpush3.bf16.msra.mxu0 %v3790_v63  ;;  %3172 = vmatprep.mubr.msk.bf16.mxu0 %vm3517_vm1, %v3516_v41  ;;  %v2390_v9 = vpack.c.bf16 %v341_v8, %v340_v6 }
0x1494   : > { %3166 = vmatprep.subr.bf16.mxu0 %v3516_v41 }
0x1497   : > { %3167 = vmatpush3.bf16.msra.mxu0 %v3794_v7  ;;  %v2104_v7 = vmul.f32 %v2055_v0, %v4092_v35  ;;  %v336_v0 = vld [vmem:[#allocation5 + $0x10] sm:$0xff] }
0x1498   : > { %3168 = vmatprep.subr.bf16.mxu0 %v3516_v41  ;;  %v2388_v4 = vpack.c.bf16 %v337_v1, %v336_v0 }
0x149b   : > { %3169 = vmatpush3.bf16.msra.mxu0 %v3798_v10 }
0x149c   : > { %3170 = vmatprep.subr.bf16.mxu0 %v3516_v41 }
0x149f   : > { %3171 = vmatpush3.bf16.msra.mxu0 %v3808_v15 }
0x14a0   : > { %3182 = vmatprep.subr.bf16.mxu0 %v3516_v41 }
0x1552   : > { %v2143_v11 = vpop.f32.mrf.mxu0 }
0x1553   : > { %v2144_v12 = vadd.f32 1e-06, %v2143_v11  ;;  %v2398_v11 = vpop.permute.xlu1 %2397 }
0x1554   : > { %v3162_v63 = vpop.f32.mrf.mxu0 }
0x1555   : > { %3340 = vrcp.f32 %v2144_v12 }
0x1556   : > { %v2146_v17 = vpop.f32.mrf.mxu0 }
0x1557   : > { %v2147_v18 = vadd.f32 1e-06, %v2146_v17  ;;  %v2403_v12 = vpop.permute.xlu1 %2402 }
0x1558   : > { %v3163_v19 = vpop.f32.mrf.mxu0 }
0x1559   : > { %3342 = vrcp.f32 %v2147_v18 }
0x155b   : > { %v2408_v63 = vpop.permute.xlu1 %2407 }
0x155f   : > { %v2413_v17 = vpop.permute.xlu1 %2412 }
0x1562   : > { %v3341_v20 = vpop.eup %3340 }
0x1563   : > { %v2151_v16 = vmul.f32 %v3341_v20, %v2104_v7  ;;  %v2418_v18 = vpop.permute.xlu1 %2417 }
0x1566   : > { %v3343_v10 = vpop.eup %3342 }
0x1567   : > { %v2153_v22 = vmul.f32 %v3343_v10, %v2105_v21  ;;  %v2423_v19 = vpop.permute.xlu1 %2422  ;;  %v3348_v10 = vld [vmem:[%s3722_s20 + $0x10] sm:$0xff] }
0x1569   : > { %v2154_v23 = vpack.c.bf16 %v2153_v22, %v2151_v16 }
0x156b   : > { %2294 = vxpose.xlu0.c.b16.start.end [1/1] (short) (narrow) %v2154_v23, 64  ;;  %3173 = vmatmul.mubr.msk.bf16.vlgmr.msra.gmra.mxu0 %vm409_vm0, %v2154_v23  ;;  %v2156_v15 = vsel %vm409_vm0, %v2154_v23, 0 }
0x156c   : > { %3183 = vmatpush3.bf16.msra.mxu0 %v2020_v62  ;;  %3177 = vmatpush3.bf16.xpose.msra.mxu1 %v2156_v15 }
0x156d   : > { %3184 = vmatprep.mubr.msk.bf16.mxu0 %vm3517_vm1, %v3516_v41 }
0x1573   : > { %3179 = vmatmul.mubr.msk.bf16.vlgmr.msra.gmra.mxu1 %vm409_vm0, %v2154_v23 }
0x15cd   : > { %v2302_v33 = vpop.trf.xlu0 }
0x15ce   : > { %3190 = vmatprep.mubr.msk.bf16.mxu1 %vm616_vm4, %v2302_v33 }
0x15d1   : > { %v2303_v44 = vpop.trf.xlu0 }
0x15d5   : > { %v2304_v46 = vpop.trf.xlu0 }
0x15d9   : > { %v2305_v47 = vpop.trf.xlu0 }
0x162b   : > { %v2192_v24 = vpop.f32.mrf.mxu0 }
0x162c   : > { %v2241_v38 = vmul.f32 %v2192_v24, %v4120_v60  ;;  %v3349_v24 = vld [vmem:[%s3722_s20] sm:$0xff] }
0x162d   : > { %v3174_v25 = vpop.f32.mrf.mxu0 }
0x162f   : > { %v2195_v26 = vpop.f32.mrf.mxu0 }
0x1630   : > { %v2242_v39 = vmul.f32 %v2195_v26, %v4122_v61 }
0x1631   : > { %v3175_v27 = vpop.f32.mrf.mxu0 }
0x1632   : > { %v2428_v27 = vpop.permute.xlu1 %2427 }
0x1633   : > { %v2233_v28 = vpop.f32.mrf.mxu1 }
0x1635   : > { %v3180_v29 = vpop.f32.mrf.mxu1 }
0x1637   : > { %v2236_v30 = vpop.f32.mrf.mxu1 }
0x1638   : > { %v2240_v31 = vpack.c.bf16 %v2236_v30, %v2233_v28  ;;  %v3350_v30 = vld [vmem:[%s3722_s20 + $0x18] sm:$0xff] }
0x1639   : > { %v3181_v32 = vpop.f32.mrf.mxu1 }
0x163a   : > { %3185 = vmatmul.mubr.msk.bf16.vlgmr.msra.gmra.mxu0 %vm616_vm4, %v2240_v31 }
0x163b   : > { %3206 = vmatprep.mubr.msk.bf16.mxu0 %vm409_vm0, %v2387_v50 }
0x16fa   : > { %v2280_v34 = vpop.f32.mrf.mxu0 }
0x16fb   : > { %v2281_v13 = vadd.f32 1e-06, %v2280_v34 }
0x16fc   : > { %v3186_v14 = vpop.f32.mrf.mxu0 }
0x16fd   : > { %3344 = vrcp.f32 %v2281_v13  ;;  %v3351_v13 = vld [vmem:[%s3722_s20 + $0x8] sm:$0xff] }
0x16fe   : > { %v2283_v41 = vpop.f32.mrf.mxu0 }
0x16ff   : > { %v2284_v35 = vadd.f32 1e-06, %v2283_v41 }
0x1700   : > { %v3187_v36 = vpop.f32.mrf.mxu0 }
0x1701   : > { %3346 = vrcp.f32 %v2284_v35 }
0x170a   : > { %v3345_v37 = vpop.eup %3344 }
0x170b   : > { %v2288_v42 = vmul.f32 %v3345_v37, %v2241_v38  ;;  %v3352_v37 = vld [vmem:[%s3722_s20 + $0x30] sm:$0xff] }
0x170e   : > { %v3347_v40 = vpop.eup %3346 }
0x170f   : > { %v2290_v43 = vmul.f32 %v3347_v40, %v2242_v39  ;;  %v2433_v40 = vpop.permute.xlu1 %2432 }
0x1711   : > { %v2704_v45 = vpack.c.bf16 %v2290_v43, %v2288_v42 }
0x1713   : > { %3188 = vmatprep.subr.msk.bf16.mxu1 %vm3833_vm3, %v2704_v45 }
0x1714   : > { %3189 = vmatpush3.bf16.msk.msra.mxu1 %vm3833_vm3, %v2704_v45 }
0x1717   : > { %3191 = vmatmul.mubr.msk.bf16.vlgmr.msra.gmra.mxu1 %vm616_vm4, %v2303_v44  ;;  %v3353_v44 = vld [vmem:[%s3722_s20 + $0x20] sm:$0xff] }
0x1718   : > { %3194 = vmatprep.mubr.msk.bf16.mxu1 %vm616_vm4, %v2304_v46 }
0x171f   : > { %3195 = vmatmul.mubr.msk.bf16.gmra.mxu1 %vm616_vm4, %v2305_v47 }
0x17d7   : > { %v3192_v51 = vpop.f32.mrf.mxu1 }
0x17d9   : > { %v2356_v53 = vpop.f32.mrf.mxu1 }
0x17db   : > { %v3193_v54 = vpop.f32.mrf.mxu1 }
0x17dc   : > { %v2392_v61 = vpack.c.bf16 %v3193_v54, %v3192_v51  ;;  %v3355_v54 = vld [vmem:[%s3722_s20 + $0x28] sm:$0xff] }
0x17dd   : > { %v2359_v55 = vpop.f32.mrf.mxu1 }
0x17de   : > { %v2391_v62 = vpack.c.bf16 %v2359_v55, %v2356_v53 }
0x17df   : > { %v3196_v56 = vpop.f32.mrf.mxu1 }
0x17e1   : > { %v2372_v52 = vpop.f32.mrf.mxu1 }
0x17e3   : > { %v3197_v57 = vpop.f32.mrf.mxu1 }
0x17e4   : > { %v2394_v58 = vpack.c.bf16 %v3197_v57, %v3196_v56 }
0x17e5   : > { %v2375_v59 = vpop.f32.mrf.mxu1 }
0x17e6   : > { %3198 = vmatprep.subr.bf16.mxu0 %v2394_v58  ;;  %v2393_v60 = vpack.c.bf16 %v2375_v59, %v2372_v52 }
0x17e7   : > { %3199 = vmatpush3.bf16.msra.mxu0 %v2394_v58 }
0x17e8   : > { %3200 = vmatprep.subr.bf16.mxu0 %v2393_v60 }
0x17eb   : > { %3201 = vmatpush3.bf16.msra.mxu0 %v2393_v60 }
0x17ec   : > { %3202 = vmatprep.subr.bf16.mxu0 %v2392_v61 }
0x17ef   : > { %3203 = vmatpush3.bf16.msra.mxu0 %v2392_v61 }
0x17f0   : > { %3204 = vmatprep.subr.bf16.mxu0 %v2391_v62 }
0x17f3   : > { %3205 = vmatpush3.bf16.msra.mxu0 %v2391_v62 }
0x17f6   : > { %3207 = vmatmul.mubr.msk.bf16.vlgmr.msra.gmra.mxu0 %vm409_vm0, %v2388_v4 }
0x17f7   : > { %3210 = vmatprep.mubr.msk.bf16.mxu0 %vm409_vm0, %v2389_v5 }
0x17fe   : > { %3211 = vmatmul.mubr.msk.bf16.gmra.mxu0 %vm409_vm0, %v2390_v9 }
0x18b6   : > { %v3208_v20 = vpop.f32.mrf.mxu0 }
0x18b7   : > { %v2490_v7 = vadd.f32 %v3208_v20, %v2408_v63 }
0x18b8   : > { %v2481_v21 = vpop.f32.mrf.mxu0 }
0x18b9   : > { %v2514_v16 = vadd.f32 %v3348_v10, %v2490_v7  ;;  %v2482_v22 = vadd.f32 %v2481_v21, %v2398_v11 }
0x18ba   : > { %v3209_v23 = vpop.f32.mrf.mxu0 }
0x18bb   : > { %v2522_v15 = vmax.f32 %v2514_v16, 0.0  ;;  %v2512_v25 = vadd.f32 %v3349_v24, %v2482_v22  ;;  %v2493_v26 = vadd.f32 %v3209_v23, %v2413_v17 }
0x18bc   : > { %v2484_v28 = vpop.f32.mrf.mxu0 }
0x18bd   : > { %2530 = vst [vmem:[%s4168_s17 + $0x10] sm:$0xff] %v2522_v15  ;;  %v2520_v29 = vmax.f32 %v2512_v25, 0.0  ;;  %v2515_v31 = vadd.f32 %v3350_v30, %v2493_v26  ;;  %v2485_v32 = vadd.f32 %v2484_v28, %v2403_v12 }
0x18be   : > { %v3212_v33 = vpop.f32.mrf.mxu0 }
0x18bf   : > { %2528 = vst [vmem:[%s4168_s17] sm:$0xff] %v2520_v29  ;;  %v2523_v34 = vmax.f32 %v2515_v31, 0.0  ;;  %v2513_v14 = vadd.f32 %v3351_v13, %v2485_v32  ;;  %v2506_v41 = vadd.f32 %v3212_v33, %v2428_v27 }
0x18c0   : > { %v2497_v35 = vpop.f32.mrf.mxu0 }
0x18c1   : > { %2531 = vst [vmem:[%s4168_s17 + $0x18] sm:$0xff] %v2523_v34  ;;  %v2521_v36 = vmax.f32 %v2513_v14, 0.0  ;;  %v2518_v38 = vadd.f32 %v3352_v37, %v2506_v41  ;;  %v2498_v39 = vadd.f32 %v2497_v35, %v2418_v18 }
0x18c2   : > { %v3213_v42 = vpop.f32.mrf.mxu0 }
0x18c3   : > { %2529 = vst [vmem:[%s4168_s17 + $0x8] sm:$0xff] %v2521_v36  ;;  %v2526_v43 = vmax.f32 %v2518_v38, 0.0  ;;  %v2516_v45 = vadd.f32 %v3353_v44, %v2498_v39  ;;  %v2509_v46 = vadd.f32 %v3213_v42, %v2433_v40 }
0x18c4   : > { %v2500_v47 = vpop.f32.mrf.mxu0 }
0x18c5   : > { %2534 = vst [vmem:[%s4168_s17 + $0x30] sm:$0xff] %v2526_v43  ;;  %v2524_v48 = vmax.f32 %v2516_v45, 0.0  ;;  %v2519_v50 = vadd.f32 %v3354_v49, %v2509_v46  ;;  %v2501_v51 = vadd.f32 %v2500_v47, %v2423_v19 }
0x18c7   : > { %2532 = vst [vmem:[%s4168_s17 + $0x20] sm:$0xff] %v2524_v48  ;;  %v2527_v53 = vmax.f32 %v2519_v50, 0.0  ;;  %v2517_v55 = vadd.f32 %v3355_v54, %v2501_v51 }
0x18c9   : > { %2535 = vst [vmem:[%s4168_s17 + $0x38] sm:$0xff] %v2527_v53  ;;  %v2525_v56 = vmax.f32 %v2517_v55, 0.0 }
0x18cb   : > { %2533 = vst [vmem:[%s4168_s17 + $0x28] sm:$0xff] %v2525_v56 }
0x18cc   : > { %3449 = shalt.err (!%p3446_p2)
}
0x18cd   : > { %s3450_s20 = scalar_lea.hbm %s4189_s11, 1024  ;;  %s3454_s29 = scalar_lea.hbm %s4240_s6, 2048 }
0x18ce   : > { %p3451_p3 = scmp.ne.s32.totalorder %s4189_s11, %s3450_s20  ;;  %p3455_p13 = scmp.lt.s32.totalorder %s4189_s11, %s4240_s6 }
0x18cf   : > { %p3456_p8 = scmp.lt.s32.totalorder %s3454_s29, %s3450_s20 }
0x18d0   : > { %p3452_p7 = pnand %p3451_p3, %p4263_p12 }
0x18d1   : > { %p3457_p4 = por %p3456_p8, %p3455_p13 }
0x18d2   : > { %p3453_p6 = pneg %p3452_p7 }
0x18d4   : > { %p3458_p11 = pnand %p3457_p4, %p3453_p6 }
0x18d6   : > { %3461 = shalt.err (!%p3458_p11)
}
0x18d7   : > { %s3519_s17 = smov 128   ;;  %s3520_s16 = smov 8  }
0x18d8   : > { %3224 = dma.vmem_to_hbm [thread:$0]  (%p4263_p12), %s4182_s14, 1024, %s4189_s11, %s2537_s19, %s3519_s17, %s3519_s17, %s3520_s16  }
0x18d9 PF: > { %s2565_s28 = sand.u32 1, %s3496_s21   ;;  %p4264_p9 = scmp.ne.s32.totalorder %s4250_s10, 0 }
0x18da   : > { %p4265_p10 = scmp.ge.s32.totalorder %s3508_s24, 2  ;;  %s2566_s30 = scalar_lea.sflag [#allocation4], %s2565_s28 }
0x18dc   : > { %p3238_p1 = pnand %p4265_p10, %p4264_p9 }
0x18de   : > { %p3239_p5 = pneg %p3238_p1 }
0x18e0   : > { %3491 = dma.done.wait (%p3239_p5), %s2566_s30, 1024  }
0x18e1   : > { %3493 = vsyncadd (%p3239_p5), %s2566_s30, 4294966272  ;;  %s4266_s7 = sld [smem:[#allocation13_spill]]  ;;  %p18_p0 = scmp.ge.s32.totalorder %s3581_s27, 4  }
0x18e2   : > { %s4267_s21 = smov %s3500_s22  ;;  %s4268_s22 = smov %s3504_s23 }
0x18e3   : > { %s4270_s24 = smov %s3581_s27  ;;  %20 = sbr.rel (!%p18_p0) target bundleno = 7 (0x7), region = 99 }
0x18e7   : > { %s4269_s23 = smov %s4266_s7 }
0x18e8   :  { %2571 = vsyncpa [#allocation3], 1 }
0x18e9   :  { %2573 = vsyncpa [#allocation3 + $0x1], 1 }
0x18ea   :  { %2574 = vsyncpa [#allocation6], 1 }
0x18eb   :  { %2575 = vsyncpa [#allocation4], 1 }
0x18ec   :  { %2577 = vsyncpa [#allocation4 + $0x1], 1 }

</bundles_post_ra>
